<compile_context>
chip_gen: v7x
topology: tpu7x:2x2x1
jax: 0.10.0
libtpu: 0.0.40
codegen_flags: <defaults>
</compile_context>

<pallas_src>
import functools
import math

import jax
import jax.numpy as jnp
from jax.experimental import pallas as pl
from jax.experimental.pallas import tpu as pltpu


PER_LAYER_REFS = 4  # w_ih3 (in,3H), w_hh3 (H,3H), b_i3 (1,3H), bhn (1,H)


# -----------------------------------------------------------------------------
# Fused kernel: all GRU layers + relu + FC head in a single program.
# -----------------------------------------------------------------------------
def grunet_kernel(*refs, num_layers, seq_len, batch, hidden):
    S, B, H = seq_len, batch, hidden
    f32 = jnp.float32

    idx = 0
    x_ref = refs[idx]; idx += 1                       # (S*B, F)  time-major, flat
    layer_refs = []
    for _ in range(num_layers):
        layer_refs.append(refs[idx:idx + PER_LAYER_REFS])
        idx += PER_LAYER_REFS
    fcw_ref = refs[idx]; idx += 1                     # (H, O)
    fcb_ref = refs[idx]; idx += 1                     # (1, O)
    y_ref = refs[idx]; idx += 1                       # (B, O)
    gi_ref = refs[idx]; idx += 1                      # (S*B, 3H) hoisted input projection
    seq_ref = refs[idx] if num_layers > 1 else None   # (S*B, H)  inter-layer activations

    h_last = None
    for l in range(num_layers):
        w_ih3, w_hh3, b_i3, bhn = layer_refs[l]

        # Hoisted, fused input projection for the whole sequence:
        # ONE (S*B, in) @ (in, 3H) matmul per layer, folded biases added once.
        inp = x_ref[...] if l == 0 else seq_ref[...]
        gi_ref[...] = jnp.dot(inp, w_ih3[...], preferred_element_type=f32) + b_i3[...]

        # Hoist weight read and the b_hh_n broadcast out of the recurrence.
        w_hh3_v = w_hh3[...]
        bhn_v = jnp.broadcast_to(bhn[...], (B, H))
        last_layer = (l == num_layers - 1)

        # --- Peeled t = 0: h0 == 0, so no h @ W_hh matmul is needed. ---------
        gi0 = gi_ref[pl.ds(0, B), :]
        r0 = jax.nn.sigmoid(gi0[:, :H])
        z0 = jax.nn.sigmoid(gi0[:, H:2 * H])
        n0 = jnp.tanh(gi0[:, 2 * H:] + r0 * bhn_v)
        h = (1.0 - z0) * n0                       # z0 * h0 == 0
        if not last_layer:
            seq_ref[pl.ds(0, B), :] = h

        # --- Remaining timesteps: single fused matmul on the serial chain. ---
        def step(t, h, w_hh3_v=w_hh3_v, bhn_v=bhn_v, last_layer=last_layer):
            gh = jnp.dot(h, w_hh3_v, preferred_element_type=f32)   # (B, 3H), one MXU op
            row = pl.multiple_of(t * B, B)
            gi_t = gi_ref[pl.ds(row, B), :]
            r = jax.nn.sigmoid(gi_t[:, :H] + gh[:, :H])
            z = jax.nn.sigmoid(gi_t[:, H:2 * H] + gh[:, H:2 * H])
            n = jnp.tanh(gi_t[:, 2 * H:] + r * (gh[:, 2 * H:] + bhn_v))
            h_new = (1.0 - z) * n + z * h
            if not last_layer:
                seq_ref[pl.ds(row, B), :] = h_new   # next layer's input stays in VMEM
            return h_new

        unroll = min(8, S - 1) if S > 1 else 1
        h_last = jax.lax.fori_loop(1, S, step, h, unroll=unroll)

    # Fused FC head: y = relu(h[-1]) @ W_fc^T + b_fc
    h_relu = jnp.maximum(h_last, 0.0)
    y_ref[...] = jnp.dot(h_relu, fcw_ref[...], preferred_element_type=f32) + fcb_ref[...]


# -----------------------------------------------------------------------------
# Parameter init (PyTorch-style) and one-time packing.
# -----------------------------------------------------------------------------
def init_params(key, input_size, hidden_size, output_size, num_layers):
    """PyTorch-style uniform(-1/sqrt(H), 1/sqrt(H)) init, deterministic."""
    params = {"layers": []}
    k = 1.0 / math.sqrt(hidden_size)
    for layer in range(num_layers):
        in_dim = input_size if layer == 0 else hidden_size
        key, k1, k2, k3, k4 = jax.random.split(key, 5)
        params["layers"].append({
            "w_ih": jax.random.uniform(k1, (3 * hidden_size, in_dim), jnp.float32, -k, k),
            "w_hh": jax.random.uniform(k2, (3 * hidden_size, hidden_size), jnp.float32, -k, k),
            "b_ih": jax.random.uniform(k3, (3 * hidden_size,), jnp.float32, -k, k),
            "b_hh": jax.random.uniform(k4, (3 * hidden_size,), jnp.float32, -k, k),
        })
    key, k1, k2 = jax.random.split(key, 3)
    params["fc_w"] = jax.random.uniform(k1, (output_size, hidden_size), jnp.float32, -k, k)
    params["fc_b"] = jax.random.uniform(k2, (output_size,), jnp.float32, -k, k)
    return params


def pack_params(params, hidden_size):
    """Fuse per-gate weights into (in,3H)/(H,3H), transpose, fold biases — done ONCE."""
    H = hidden_size
    packed = {
        "layers": [],
        "fc_w_t": jnp.transpose(params["fc_w"]),          # (H, O)
        "fc_b": params["fc_b"].reshape(1, -1),            # (1, O)
    }
    for lp in params["layers"]:
        w_ih, w_hh = lp["w_ih"], lp["w_hh"]               # (3H, in), (3H, H), rows [r;z;n]
        b_ih, b_hh = lp["b_ih"], lp["b_hh"]               # (3H,)
        packed["layers"].append({
            "w_ih3": jnp.transpose(w_ih),                 # (in, 3H), columns [r | z | n]
            "w_hh3": jnp.transpose(w_hh),                 # (H, 3H)
            # Folded input-side bias slab: [b_ih_r+b_hh_r | b_ih_z+b_hh_z | b_ih_n]
            "b_i3": jnp.concatenate([b_ih[0:H] + b_hh[0:H],
                                     b_ih[H:2 * H] + b_hh[H:2 * H],
                                     b_ih[2 * H:3 * H]]).reshape(1, 3 * H),
            # Hidden-side n bias stays separate (multiplied by r inside the loop).
            "bhn": b_hh[2 * H:3 * H].reshape(1, H),
        })
    return packed


# -----------------------------------------------------------------------------
# Forward: one pallas_call for the whole network.
# -----------------------------------------------------------------------------
def gru_net_forward(packed, x, hidden_size, num_layers):
    """x: (batch, seq, input_size) — PyTorch batch_first convention."""
    B, S, F = x.shape
    H = hidden_size
    O = packed["fc_w_t"].shape[1]

    # Time-major, FLAT layout (S*B, F): all reshapes happen in the wrapper so the
    # kernel never does tile-crossing relayouts.
    x_flat = jnp.transpose(x, (1, 0, 2)).reshape(S * B, F).astype(jnp.float32)

    flat = [x_flat]
    for lp in packed["layers"]:
        flat += [lp["w_ih3"], lp["w_hh3"], lp["b_i3"], lp["bhn"]]
    flat += [packed["fc_w_t"], packed["fc_b"]]

    kernel = functools.partial(grunet_kernel, num_layers=num_layers,
                               seq_len=S, batch=B, hidden=H)

    scratch_shapes = [pltpu.VMEM((S * B, 3 * H), jnp.float32)]   # fused gi slab
    if num_layers > 1:
        scratch_shapes.append(pltpu.VMEM((S * B, H), jnp.float32))  # inter-layer seq

    # Advisory cost estimate so XLA schedules around the single fused custom call.
    flops, trans, in_dim = 0, 0, F
    for _ in range(num_layers):
        flops += 2 * S * B * in_dim * 3 * H      # hoisted input projection
        flops += 2 * S * B * H * 3 * H           # recurrent h @ W_hh3
        trans += 3 * S * B * H                   # 2 sigmoids + 1 tanh per step
        in_dim = H
    flops += 2 * B * H * O                       # FC head
    bytes_accessed = 4 * (sum(int(a.size) for a in flat) + B * O)

    return pl.pallas_call(
        kernel,
        out_shape=jax.ShapeDtypeStruct((B, O), jnp.float32),
        in_specs=[pl.BlockSpec(memory_space=pltpu.MemorySpace.VMEM)] * len(flat),
        out_specs=pl.BlockSpec(memory_space=pltpu.MemorySpace.VMEM),
        scratch_shapes=scratch_shapes,
        cost_estimate=pl.CostEstimate(flops=flops, transcendentals=trans,
                                      bytes_accessed=bytes_accessed),
    )(*flat)


# -----------------------------------------------------------------------------
# Pure-JAX reference (sanity check against the Pallas kernel)
# -----------------------------------------------------------------------------
def gru_net_reference(params, x, hidden_size):
    H = hidden_size
    cur = jnp.transpose(x, (1, 0, 2)).astype(jnp.float32)  # (S, B, F)
    B = cur.shape[1]
    for lp in params["layers"]:
        def step(h, x_t, lp=lp):
            gi = x_t @ lp["w_ih"].T + lp["b_ih"]
            gh = h @ lp["w_hh"].T + lp["b_hh"]
            r = jax.nn.sigmoid(gi[:, :H] + gh[:, :H])
            z = jax.nn.sigmoid(gi[:, H:2 * H] + gh[:, H:2 * H])
            n = jnp.tanh(gi[:, 2 * H:] + r * gh[:, 2 * H:])
            h_new = (1.0 - z) * n + z * h
            return h_new, h_new
        h0 = jnp.zeros((B, H), jnp.float32)
        _, cur = jax.lax.scan(step, h0, cur)
    h_last = cur[-1]
    return jnp.maximum(h_last, 0.0) @ params["fc_w"].T + params["fc_b"]


if __name__ == "__main__":
    batch, seq, input_size = 2, 8, 4
    hidden_size, output_size, num_layers = 32, 8, 2

    key = jax.random.PRNGKey(0)
    key, xkey = jax.random.split(key)
    x = jax.random.normal(xkey, (batch, seq, input_size), dtype=jnp.float32)

    params = init_params(key, input_size, hidden_size, output_size, num_layers)
    packed = pack_params(params, hidden_size)

    y = gru_net_forward(packed, x, hidden_size, num_layers)
    y = jax.block_until_ready(y)

    y_ref = jax.block_until_ready(gru_net_reference(params, x, hidden_size))
    assert y.shape == (batch, output_size)
    assert jnp.allclose(y, y_ref, atol=1e-4, rtol=1e-4), "Pallas output mismatch vs reference"

    print("KERNEL_OK")
</pallas_src>

<mosaic_0001>
module attributes {stable_mosaic.version = 11 : i64} {
  func.func @grunet_kernel(%arg0: memref<16x4xf32, #tpu.memory_space<vmem>>, %arg1: memref<4x96xf32, #tpu.memory_space<vmem>>, %arg2: memref<32x96xf32, #tpu.memory_space<vmem>>, %arg3: memref<1x96xf32, #tpu.memory_space<vmem>>, %arg4: memref<1x32xf32, #tpu.memory_space<vmem>>, %arg5: memref<32x96xf32, #tpu.memory_space<vmem>>, %arg6: memref<32x96xf32, #tpu.memory_space<vmem>>, %arg7: memref<1x96xf32, #tpu.memory_space<vmem>>, %arg8: memref<1x32xf32, #tpu.memory_space<vmem>>, %arg9: memref<32x8xf32, #tpu.memory_space<vmem>>, %arg10: memref<1x8xf32, #tpu.memory_space<vmem>>, %arg11: memref<2x8xf32, #tpu.memory_space<vmem>>, %arg12: memref<16x96xf32, #tpu.memory_space<vmem>>, %arg13: memref<16x32xf32, #tpu.memory_space<vmem>>) attributes {dimension_semantics = [], scalar_prefetch = 0 : i64, scratch_operands = 2 : i64, tpu.core_type = #tpu.core_type<tc>} {
    %c0 = arith.constant 0 : index
    %c0_0 = arith.constant 0 : index
    %0 = vector.load %arg0[%c0, %c0_0] : memref<16x4xf32, #tpu.memory_space<vmem>>, vector<16x4xf32>
    %c0_1 = arith.constant 0 : index
    %c0_2 = arith.constant 0 : index
    %1 = vector.load %arg1[%c0_1, %c0_2] : memref<4x96xf32, #tpu.memory_space<vmem>>, vector<4x96xf32>
    %cst = arith.constant dense<0.000000e+00> : vector<16x96xf32>
    %2 = tpu.matmul %0, %1, %cst {dimension_numbers = #tpu.dot_dimension_numbers<[1], [0], [0], [1], [0, 0, 1, 1], [], []>} : vector<16x4xf32>, vector<4x96xf32>, vector<16x96xf32> -> vector<16x96xf32>
    %c0_3 = arith.constant 0 : index
    %c0_4 = arith.constant 0 : index
    %3 = vector.load %arg3[%c0_3, %c0_4] : memref<1x96xf32, #tpu.memory_space<vmem>>, vector<1x96xf32>
    %4 = vector.broadcast %3 : vector<1x96xf32> to vector<16x96xf32>
    %5 = arith.addf %2, %4 : vector<16x96xf32>
    %c0_5 = arith.constant 0 : index
    %c0_6 = arith.constant 0 : index
    %6 = vector.load %arg12[%c0_5, %c0_6] : memref<16x96xf32, #tpu.memory_space<vmem>>, vector<16x96xf32>
    tpu.vector_store %arg12[%c0_5, %c0_6], %5 {strides = array<i32>} : memref<16x96xf32, #tpu.memory_space<vmem>>, vector<16x96xf32>,
    %c0_7 = arith.constant 0 : index
    %c0_8 = arith.constant 0 : index
    %7 = vector.load %arg2[%c0_7, %c0_8] : memref<32x96xf32, #tpu.memory_space<vmem>>, vector<32x96xf32>
    %c0_9 = arith.constant 0 : index
    %c0_10 = arith.constant 0 : index
    %8 = vector.load %arg4[%c0_9, %c0_10] : memref<1x32xf32, #tpu.memory_space<vmem>>, vector<1x32xf32>
    %9 = vector.shape_cast %8 : vector<1x32xf32> to vector<1x32xf32>
    %10 = vector.broadcast %9 : vector<1x32xf32> to vector<2x32xf32>
    %c0_11 = arith.constant 0 : index
    %c0_12 = arith.constant 0 : index
    %11 = vector.load %arg12[%c0_11, %c0_12] : memref<16x96xf32, #tpu.memory_space<vmem>>, vector<2x96xf32>
    %12 = vector.extract_strided_slice %11 {offsets = [0, 0], sizes = [2, 32], strides = [1, 1]} : vector<2x96xf32> to vector<2x32xf32>
    %13 = arith.negf %12 : vector<2x32xf32>
    %14 = math.exp %13 : vector<2x32xf32>
    %cst_13 = arith.constant 1.000000e+00 : f32
    %15 = vector.broadcast %cst_13 : f32 to vector<2x32xf32>
    %16 = arith.addf %15, %14 : vector<2x32xf32>
    %17 = arith.divf %15, %16 : vector<2x32xf32>
    %18 = vector.extract_strided_slice %11 {offsets = [0, 32], sizes = [2, 32], strides = [1, 1]} : vector<2x96xf32> to vector<2x32xf32>
    %19 = arith.negf %18 : vector<2x32xf32>
    %20 = math.exp %19 : vector<2x32xf32>
    %cst_14 = arith.constant 1.000000e+00 : f32
    %21 = vector.broadcast %cst_14 : f32 to vector<2x32xf32>
    %22 = arith.addf %21, %20 : vector<2x32xf32>
    %23 = arith.divf %21, %22 : vector<2x32xf32>
    %24 = vector.extract_strided_slice %11 {offsets = [0, 64], sizes = [2, 32], strides = [1, 1]} : vector<2x96xf32> to vector<2x32xf32>
    %25 = arith.mulf %17, %10 : vector<2x32xf32>
    %26 = arith.addf %24, %25 : vector<2x32xf32>
    %27 = math.tanh %26 : vector<2x32xf32>
    %cst_15 = arith.constant 1.000000e+00 : f32
    %28 = vector.broadcast %cst_15 : f32 to vector<2x32xf32>
    %29 = arith.subf %28, %23 : vector<2x32xf32>
    %30 = arith.mulf %29, %27 : vector<2x32xf32>
    %c0_16 = arith.constant 0 : index
    %c0_17 = arith.constant 0 : index
    %31 = vector.load %arg13[%c0_16, %c0_17] : memref<16x32xf32, #tpu.memory_space<vmem>>, vector<2x32xf32>
    tpu.vector_store %arg13[%c0_16, %c0_17], %30 {strides = array<i32>} : memref<16x32xf32, #tpu.memory_space<vmem>>, vector<2x32xf32>,
    %c1_i32 = arith.constant 1 : i32
    %cst_18 = arith.constant dense<0.000000e+00> : vector<2x96xf32>
    %32 = tpu.matmul %30, %7, %cst_18 {dimension_numbers = #tpu.dot_dimension_numbers<[1], [0], [0], [1], [0, 0, 1, 1], [], []>} : vector<2x32xf32>, vector<32x96xf32>, vector<2x96xf32> -> vector<2x96xf32>
    %c2_i32 = arith.constant 2 : i32
    %33 = arith.muli %c1_i32, %c2_i32 : i32
    %34 = tpu.assume_multiple %33, 2 : i32
    %35 = arith.index_cast %34 : i32 to index
    %c0_19 = arith.constant 0 : index
    %36 = vector.load %arg12[%35, %c0_19] : memref<16x96xf32, #tpu.memory_space<vmem>>, vector<2x96xf32>
    %37 = vector.extract_strided_slice %36 {offsets = [0, 0], sizes = [2, 32], strides = [1, 1]} : vector<2x96xf32> to vector<2x32xf32>
    %38 = vector.extract_strided_slice %32 {offsets = [0, 0], sizes = [2, 32], strides = [1, 1]} : vector<2x96xf32> to vector<2x32xf32>
    %39 = arith.addf %37, %38 : vector<2x32xf32>
    %40 = arith.negf %39 : vector<2x32xf32>
    %41 = math.exp %40 : vector<2x32xf32>
    %cst_20 = arith.constant 1.000000e+00 : f32
    %42 = vector.broadcast %cst_20 : f32 to vector<2x32xf32>
    %43 = arith.addf %42, %41 : vector<2x32xf32>
    %44 = arith.divf %42, %43 : vector<2x32xf32>
    %45 = vector.extract_strided_slice %36 {offsets = [0, 32], sizes = [2, 32], strides = [1, 1]} : vector<2x96xf32> to vector<2x32xf32>
    %46 = vector.extract_strided_slice %32 {offsets = [0, 32], sizes = [2, 32], strides = [1, 1]} : vector<2x96xf32> to vector<2x32xf32>
    %47 = arith.addf %45, %46 : vector<2x32xf32>
    %48 = arith.negf %47 : vector<2x32xf32>
    %49 = math.exp %48 : vector<2x32xf32>
    %cst_21 = arith.constant 1.000000e+00 : f32
    %50 = vector.broadcast %cst_21 : f32 to vector<2x32xf32>
    %51 = arith.addf %50, %49 : vector<2x32xf32>
    %52 = arith.divf %50, %51 : vector<2x32xf32>
    %53 = vector.extract_strided_slice %36 {offsets = [0, 64], sizes = [2, 32], strides = [1, 1]} : vector<2x96xf32> to vector<2x32xf32>
    %54 = vector.extract_strided_slice %32 {offsets = [0, 64], sizes = [2, 32], strides = [1, 1]} : vector<2x96xf32> to vector<2x32xf32>
    %55 = arith.addf %54, %10 : vector<2x32xf32>
    %56 = arith.mulf %44, %55 : vector<2x32xf32>
    %57 = arith.addf %53, %56 : vector<2x32xf32>
    %58 = math.tanh %57 : vector<2x32xf32>
    %cst_22 = arith.constant 1.000000e+00 : f32
    %59 = vector.broadcast %cst_22 : f32 to vector<2x32xf32>
    %60 = arith.subf %59, %52 : vector<2x32xf32>
    %61 = arith.mulf %60, %58 : vector<2x32xf32>
    %62 = arith.mulf %52, %30 : vector<2x32xf32>
    %63 = arith.addf %61, %62 : vector<2x32xf32>
    %64 = arith.index_cast %34 : i32 to index
    %c0_23 = arith.constant 0 : index
    %65 = vector.load %arg13[%64, %c0_23] : memref<16x32xf32, #tpu.memory_space<vmem>>, vector<2x32xf32>
    tpu.vector_store %arg13[%64, %c0_23], %63 {strides = array<i32>} : memref<16x32xf32, #tpu.memory_space<vmem>>, vector<2x32xf32>,
    %c2_i32_24 = arith.constant 2 : i32
    %cst_25 = arith.constant dense<0.000000e+00> : vector<2x96xf32>
    %66 = tpu.matmul %63, %7, %cst_25 {dimension_numbers = #tpu.dot_dimension_numbers<[1], [0], [0], [1], [0, 0, 1, 1], [], []>} : vector<2x32xf32>, vector<32x96xf32>, vector<2x96xf32> -> vector<2x96xf32>
    %c2_i32_26 = arith.constant 2 : i32
    %67 = arith.muli %c2_i32_24, %c2_i32_26 : i32
    %68 = tpu.assume_multiple %67, 2 : i32
    %69 = arith.index_cast %68 : i32 to index
    %c0_27 = arith.constant 0 : index
    %70 = vector.load %arg12[%69, %c0_27] : memref<16x96xf32, #tpu.memory_space<vmem>>, vector<2x96xf32>
    %71 = vector.extract_strided_slice %70 {offsets = [0, 0], sizes = [2, 32], strides = [1, 1]} : vector<2x96xf32> to vector<2x32xf32>
    %72 = vector.extract_strided_slice %66 {offsets = [0, 0], sizes = [2, 32], strides = [1, 1]} : vector<2x96xf32> to vector<2x32xf32>
    %73 = arith.addf %71, %72 : vector<2x32xf32>
    %74 = arith.negf %73 : vector<2x32xf32>
    %75 = math.exp %74 : vector<2x32xf32>
    %cst_28 = arith.constant 1.000000e+00 : f32
    %76 = vector.broadcast %cst_28 : f32 to vector<2x32xf32>
    %77 = arith.addf %76, %75 : vector<2x32xf32>
    %78 = arith.divf %76, %77 : vector<2x32xf32>
    %79 = vector.extract_strided_slice %70 {offsets = [0, 32], sizes = [2, 32], strides = [1, 1]} : vector<2x96xf32> to vector<2x32xf32>
    %80 = vector.extract_strided_slice %66 {offsets = [0, 32], sizes = [2, 32], strides = [1, 1]} : vector<2x96xf32> to vector<2x32xf32>
    %81 = arith.addf %79, %80 : vector<2x32xf32>
    %82 = arith.negf %81 : vector<2x32xf32>
    %83 = math.exp %82 : vector<2x32xf32>
    %cst_29 = arith.constant 1.000000e+00 : f32
    %84 = vector.broadcast %cst_29 : f32 to vector<2x32xf32>
    %85 = arith.addf %84, %83 : vector<2x32xf32>
    %86 = arith.divf %84, %85 : vector<2x32xf32>
    %87 = vector.extract_strided_slice %70 {offsets = [0, 64], sizes = [2, 32], strides = [1, 1]} : vector<2x96xf32> to vector<2x32xf32>
    %88 = vector.extract_strided_slice %66 {offsets = [0, 64], sizes = [2, 32], strides = [1, 1]} : vector<2x96xf32> to vector<2x32xf32>
    %89 = arith.addf %88, %10 : vector<2x32xf32>
    %90 = arith.mulf %78, %89 : vector<2x32xf32>
    %91 = arith.addf %87, %90 : vector<2x32xf32>
    %92 = math.tanh %91 : vector<2x32xf32>
    %cst_30 = arith.constant 1.000000e+00 : f32
    %93 = vector.broadcast %cst_30 : f32 to vector<2x32xf32>
    %94 = arith.subf %93, %86 : vector<2x32xf32>
    %95 = arith.mulf %94, %92 : vector<2x32xf32>
    %96 = arith.mulf %86, %63 : vector<2x32xf32>
    %97 = arith.addf %95, %96 : vector<2x32xf32>
    %98 = arith.index_cast %68 : i32 to index
    %c0_31 = arith.constant 0 : index
    %99 = vector.load %arg13[%98, %c0_31] : memref<16x32xf32, #tpu.memory_space<vmem>>, vector<2x32xf32>
    tpu.vector_store %arg13[%98, %c0_31], %97 {strides = array<i32>} : memref<16x32xf32, #tpu.memory_space<vmem>>, vector<2x32xf32>,
    %c3_i32 = arith.constant 3 : i32
    %cst_32 = arith.constant dense<0.000000e+00> : vector<2x96xf32>
    %100 = tpu.matmul %97, %7, %cst_32 {dimension_numbers = #tpu.dot_dimension_numbers<[1], [0], [0], [1], [0, 0, 1, 1], [], []>} : vector<2x32xf32>, vector<32x96xf32>, vector<2x96xf32> -> vector<2x96xf32>
    %c2_i32_33 = arith.constant 2 : i32
    %101 = arith.muli %c3_i32, %c2_i32_33 : i32
    %102 = tpu.assume_multiple %101, 2 : i32
    %103 = arith.index_cast %102 : i32 to index
    %c0_34 = arith.constant 0 : index
    %104 = vector.load %arg12[%103, %c0_34] : memref<16x96xf32, #tpu.memory_space<vmem>>, vector<2x96xf32>
    %105 = vector.extract_strided_slice %104 {offsets = [0, 0], sizes = [2, 32], strides = [1, 1]} : vector<2x96xf32> to vector<2x32xf32>
    %106 = vector.extract_strided_slice %100 {offsets = [0, 0], sizes = [2, 32], strides = [1, 1]} : vector<2x96xf32> to vector<2x32xf32>
    %107 = arith.addf %105, %106 : vector<2x32xf32>
    %108 = arith.negf %107 : vector<2x32xf32>
    %109 = math.exp %108 : vector<2x32xf32>
    %cst_35 = arith.constant 1.000000e+00 : f32
    %110 = vector.broadcast %cst_35 : f32 to vector<2x32xf32>
    %111 = arith.addf %110, %109 : vector<2x32xf32>
    %112 = arith.divf %110, %111 : vector<2x32xf32>
    %113 = vector.extract_strided_slice %104 {offsets = [0, 32], sizes = [2, 32], strides = [1, 1]} : vector<2x96xf32> to vector<2x32xf32>
    %114 = vector.extract_strided_slice %100 {offsets = [0, 32], sizes = [2, 32], strides = [1, 1]} : vector<2x96xf32> to vector<2x32xf32>
    %115 = arith.addf %113, %114 : vector<2x32xf32>
    %116 = arith.negf %115 : vector<2x32xf32>
    %117 = math.exp %116 : vector<2x32xf32>
    %cst_36 = arith.constant 1.000000e+00 : f32
    %118 = vector.broadcast %cst_36 : f32 to vector<2x32xf32>
    %119 = arith.addf %118, %117 : vector<2x32xf32>
    %120 = arith.divf %118, %119 : vector<2x32xf32>
    %121 = vector.extract_strided_slice %104 {offsets = [0, 64], sizes = [2, 32], strides = [1, 1]} : vector<2x96xf32> to vector<2x32xf32>
    %122 = vector.extract_strided_slice %100 {offsets = [0, 64], sizes = [2, 32], strides = [1, 1]} : vector<2x96xf32> to vector<2x32xf32>
    %123 = arith.addf %122, %10 : vector<2x32xf32>
    %124 = arith.mulf %112, %123 : vector<2x32xf32>
    %125 = arith.addf %121, %124 : vector<2x32xf32>
    %126 = math.tanh %125 : vector<2x32xf32>
    %cst_37 = arith.constant 1.000000e+00 : f32
    %127 = vector.broadcast %cst_37 : f32 to vector<2x32xf32>
    %128 = arith.subf %127, %120 : vector<2x32xf32>
    %129 = arith.mulf %128, %126 : vector<2x32xf32>
    %130 = arith.mulf %120, %97 : vector<2x32xf32>
    %131 = arith.addf %129, %130 : vector<2x32xf32>
    %132 = arith.index_cast %102 : i32 to index
    %c0_38 = arith.constant 0 : index
    %133 = vector.load %arg13[%132, %c0_38] : memref<16x32xf32, #tpu.memory_space<vmem>>, vector<2x32xf32>
    tpu.vector_store %arg13[%132, %c0_38], %131 {strides = array<i32>} : memref<16x32xf32, #tpu.memory_space<vmem>>, vector<2x32xf32>,
    %c4_i32 = arith.constant 4 : i32
    %cst_39 = arith.constant dense<0.000000e+00> : vector<2x96xf32>
    %134 = tpu.matmul %131, %7, %cst_39 {dimension_numbers = #tpu.dot_dimension_numbers<[1], [0], [0], [1], [0, 0, 1, 1], [], []>} : vector<2x32xf32>, vector<32x96xf32>, vector<2x96xf32> -> vector<2x96xf32>
    %c2_i32_40 = arith.constant 2 : i32
    %135 = arith.muli %c4_i32, %c2_i32_40 : i32
    %136 = tpu.assume_multiple %135, 2 : i32
    %137 = arith.index_cast %136 : i32 to index
    %c0_41 = arith.constant 0 : index
    %138 = vector.load %arg12[%137, %c0_41] : memref<16x96xf32, #tpu.memory_space<vmem>>, vector<2x96xf32>
    %139 = vector.extract_strided_slice %138 {offsets = [0, 0], sizes = [2, 32], strides = [1, 1]} : vector<2x96xf32> to vector<2x32xf32>
    %140 = vector.extract_strided_slice %134 {offsets = [0, 0], sizes = [2, 32], strides = [1, 1]} : vector<2x96xf32> to vector<2x32xf32>
    %141 = arith.addf %139, %140 : vector<2x32xf32>
    %142 = arith.negf %141 : vector<2x32xf32>
    %143 = math.exp %142 : vector<2x32xf32>
    %cst_42 = arith.constant 1.000000e+00 : f32
    %144 = vector.broadcast %cst_42 : f32 to vector<2x32xf32>
    %145 = arith.addf %144, %143 : vector<2x32xf32>
    %146 = arith.divf %144, %145 : vector<2x32xf32>
    %147 = vector.extract_strided_slice %138 {offsets = [0, 32], sizes = [2, 32], strides = [1, 1]} : vector<2x96xf32> to vector<2x32xf32>
    %148 = vector.extract_strided_slice %134 {offsets = [0, 32], sizes = [2, 32], strides = [1, 1]} : vector<2x96xf32> to vector<2x32xf32>
    %149 = arith.addf %147, %148 : vector<2x32xf32>
    %150 = arith.negf %149 : vector<2x32xf32>
    %151 = math.exp %150 : vector<2x32xf32>
    %cst_43 = arith.constant 1.000000e+00 : f32
    %152 = vector.broadcast %cst_43 : f32 to vector<2x32xf32>
    %153 = arith.addf %152, %151 : vector<2x32xf32>
    %154 = arith.divf %152, %153 : vector<2x32xf32>
    %155 = vector.extract_strided_slice %138 {offsets = [0, 64], sizes = [2, 32], strides = [1, 1]} : vector<2x96xf32> to vector<2x32xf32>
    %156 = vector.extract_strided_slice %134 {offsets = [0, 64], sizes = [2, 32], strides = [1, 1]} : vector<2x96xf32> to vector<2x32xf32>
    %157 = arith.addf %156, %10 : vector<2x32xf32>
    %158 = arith.mulf %146, %157 : vector<2x32xf32>
    %159 = arith.addf %155, %158 : vector<2x32xf32>
    %160 = math.tanh %159 : vector<2x32xf32>
    %cst_44 = arith.constant 1.000000e+00 : f32
    %161 = vector.broadcast %cst_44 : f32 to vector<2x32xf32>
    %162 = arith.subf %161, %154 : vector<2x32xf32>
    %163 = arith.mulf %162, %160 : vector<2x32xf32>
    %164 = arith.mulf %154, %131 : vector<2x32xf32>
    %165 = arith.addf %163, %164 : vector<2x32xf32>
    %166 = arith.index_cast %136 : i32 to index
    %c0_45 = arith.constant 0 : index
    %167 = vector.load %arg13[%166, %c0_45] : memref<16x32xf32, #tpu.memory_space<vmem>>, vector<2x32xf32>
    tpu.vector_store %arg13[%166, %c0_45], %165 {strides = array<i32>} : memref<16x32xf32, #tpu.memory_space<vmem>>, vector<2x32xf32>,
    %c5_i32 = arith.constant 5 : i32
    %cst_46 = arith.constant dense<0.000000e+00> : vector<2x96xf32>
    %168 = tpu.matmul %165, %7, %cst_46 {dimension_numbers = #tpu.dot_dimension_numbers<[1], [0], [0], [1], [0, 0, 1, 1], [], []>} : vector<2x32xf32>, vector<32x96xf32>, vector<2x96xf32> -> vector<2x96xf32>
    %c2_i32_47 = arith.constant 2 : i32
    %169 = arith.muli %c5_i32, %c2_i32_47 : i32
    %170 = tpu.assume_multiple %169, 2 : i32
    %171 = arith.index_cast %170 : i32 to index
    %c0_48 = arith.constant 0 : index
    %172 = vector.load %arg12[%171, %c0_48] : memref<16x96xf32, #tpu.memory_space<vmem>>, vector<2x96xf32>
    %173 = vector.extract_strided_slice %172 {offsets = [0, 0], sizes = [2, 32], strides = [1, 1]} : vector<2x96xf32> to vector<2x32xf32>
    %174 = vector.extract_strided_slice %168 {offsets = [0, 0], sizes = [2, 32], strides = [1, 1]} : vector<2x96xf32> to vector<2x32xf32>
    %175 = arith.addf %173, %174 : vector<2x32xf32>
    %176 = arith.negf %175 : vector<2x32xf32>
    %177 = math.exp %176 : vector<2x32xf32>
    %cst_49 = arith.constant 1.000000e+00 : f32
    %178 = vector.broadcast %cst_49 : f32 to vector<2x32xf32>
    %179 = arith.addf %178, %177 : vector<2x32xf32>
    %180 = arith.divf %178, %179 : vector<2x32xf32>
    %181 = vector.extract_strided_slice %172 {offsets = [0, 32], sizes = [2, 32], strides = [1, 1]} : vector<2x96xf32> to vector<2x32xf32>
    %182 = vector.extract_strided_slice %168 {offsets = [0, 32], sizes = [2, 32], strides = [1, 1]} : vector<2x96xf32> to vector<2x32xf32>
    %183 = arith.addf %181, %182 : vector<2x32xf32>
    %184 = arith.negf %183 : vector<2x32xf32>
    %185 = math.exp %184 : vector<2x32xf32>
    %cst_50 = arith.constant 1.000000e+00 : f32
    %186 = vector.broadcast %cst_50 : f32 to vector<2x32xf32>
    %187 = arith.addf %186, %185 : vector<2x32xf32>
    %188 = arith.divf %186, %187 : vector<2x32xf32>
    %189 = vector.extract_strided_slice %172 {offsets = [0, 64], sizes = [2, 32], strides = [1, 1]} : vector<2x96xf32> to vector<2x32xf32>
    %190 = vector.extract_strided_slice %168 {offsets = [0, 64], sizes = [2, 32], strides = [1, 1]} : vector<2x96xf32> to vector<2x32xf32>
    %191 = arith.addf %190, %10 : vector<2x32xf32>
    %192 = arith.mulf %180, %191 : vector<2x32xf32>
    %193 = arith.addf %189, %192 : vector<2x32xf32>
    %194 = math.tanh %193 : vector<2x32xf32>
    %cst_51 = arith.constant 1.000000e+00 : f32
    %195 = vector.broadcast %cst_51 : f32 to vector<2x32xf32>
    %196 = arith.subf %195, %188 : vector<2x32xf32>
    %197 = arith.mulf %196, %194 : vector<2x32xf32>
    %198 = arith.mulf %188, %165 : vector<2x32xf32>
    %199 = arith.addf %197, %198 : vector<2x32xf32>
    %200 = arith.index_cast %170 : i32 to index
    %c0_52 = arith.constant 0 : index
    %201 = vector.load %arg13[%200, %c0_52] : memref<16x32xf32, #tpu.memory_space<vmem>>, vector<2x32xf32>
    tpu.vector_store %arg13[%200, %c0_52], %199 {strides = array<i32>} : memref<16x32xf32, #tpu.memory_space<vmem>>, vector<2x32xf32>,
    %c6_i32 = arith.constant 6 : i32
    %cst_53 = arith.constant dense<0.000000e+00> : vector<2x96xf32>
    %202 = tpu.matmul %199, %7, %cst_53 {dimension_numbers = #tpu.dot_dimension_numbers<[1], [0], [0], [1], [0, 0, 1, 1], [], []>} : vector<2x32xf32>, vector<32x96xf32>, vector<2x96xf32> -> vector<2x96xf32>
    %c2_i32_54 = arith.constant 2 : i32
    %203 = arith.muli %c6_i32, %c2_i32_54 : i32
    %204 = tpu.assume_multiple %203, 2 : i32
    %205 = arith.index_cast %204 : i32 to index
    %c0_55 = arith.constant 0 : index
    %206 = vector.load %arg12[%205, %c0_55] : memref<16x96xf32, #tpu.memory_space<vmem>>, vector<2x96xf32>
    %207 = vector.extract_strided_slice %206 {offsets = [0, 0], sizes = [2, 32], strides = [1, 1]} : vector<2x96xf32> to vector<2x32xf32>
    %208 = vector.extract_strided_slice %202 {offsets = [0, 0], sizes = [2, 32], strides = [1, 1]} : vector<2x96xf32> to vector<2x32xf32>
    %209 = arith.addf %207, %208 : vector<2x32xf32>
    %210 = arith.negf %209 : vector<2x32xf32>
    %211 = math.exp %210 : vector<2x32xf32>
    %cst_56 = arith.constant 1.000000e+00 : f32
    %212 = vector.broadcast %cst_56 : f32 to vector<2x32xf32>
    %213 = arith.addf %212, %211 : vector<2x32xf32>
    %214 = arith.divf %212, %213 : vector<2x32xf32>
    %215 = vector.extract_strided_slice %206 {offsets = [0, 32], sizes = [2, 32], strides = [1, 1]} : vector<2x96xf32> to vector<2x32xf32>
    %216 = vector.extract_strided_slice %202 {offsets = [0, 32], sizes = [2, 32], strides = [1, 1]} : vector<2x96xf32> to vector<2x32xf32>
    %217 = arith.addf %215, %216 : vector<2x32xf32>
    %218 = arith.negf %217 : vector<2x32xf32>
    %219 = math.exp %218 : vector<2x32xf32>
    %cst_57 = arith.constant 1.000000e+00 : f32
    %220 = vector.broadcast %cst_57 : f32 to vector<2x32xf32>
    %221 = arith.addf %220, %219 : vector<2x32xf32>
    %222 = arith.divf %220, %221 : vector<2x32xf32>
    %223 = vector.extract_strided_slice %206 {offsets = [0, 64], sizes = [2, 32], strides = [1, 1]} : vector<2x96xf32> to vector<2x32xf32>
    %224 = vector.extract_strided_slice %202 {offsets = [0, 64], sizes = [2, 32], strides = [1, 1]} : vector<2x96xf32> to vector<2x32xf32>
    %225 = arith.addf %224, %10 : vector<2x32xf32>
    %226 = arith.mulf %214, %225 : vector<2x32xf32>
    %227 = arith.addf %223, %226 : vector<2x32xf32>
    %228 = math.tanh %227 : vector<2x32xf32>
    %cst_58 = arith.constant 1.000000e+00 : f32
    %229 = vector.broadcast %cst_58 : f32 to vector<2x32xf32>
    %230 = arith.subf %229, %222 : vector<2x32xf32>
    %231 = arith.mulf %230, %228 : vector<2x32xf32>
    %232 = arith.mulf %222, %199 : vector<2x32xf32>
    %233 = arith.addf %231, %232 : vector<2x32xf32>
    %234 = arith.index_cast %204 : i32 to index
    %c0_59 = arith.constant 0 : index
    %235 = vector.load %arg13[%234, %c0_59] : memref<16x32xf32, #tpu.memory_space<vmem>>, vector<2x32xf32>
    tpu.vector_store %arg13[%234, %c0_59], %233 {strides = array<i32>} : memref<16x32xf32, #tpu.memory_space<vmem>>, vector<2x32xf32>,
    %c7_i32 = arith.constant 7 : i32
    %cst_60 = arith.constant dense<0.000000e+00> : vector<2x96xf32>
    %236 = tpu.matmul %233, %7, %cst_60 {dimension_numbers = #tpu.dot_dimension_numbers<[1], [0], [0], [1], [0, 0, 1, 1], [], []>} : vector<2x32xf32>, vector<32x96xf32>, vector<2x96xf32> -> vector<2x96xf32>
    %c2_i32_61 = arith.constant 2 : i32
    %237 = arith.muli %c7_i32, %c2_i32_61 : i32
    %238 = tpu.assume_multiple %237, 2 : i32
    %239 = arith.index_cast %238 : i32 to index
    %c0_62 = arith.constant 0 : index
    %240 = vector.load %arg12[%239, %c0_62] : memref<16x96xf32, #tpu.memory_space<vmem>>, vector<2x96xf32>
    %241 = vector.extract_strided_slice %240 {offsets = [0, 0], sizes = [2, 32], strides = [1, 1]} : vector<2x96xf32> to vector<2x32xf32>
    %242 = vector.extract_strided_slice %236 {offsets = [0, 0], sizes = [2, 32], strides = [1, 1]} : vector<2x96xf32> to vector<2x32xf32>
    %243 = arith.addf %241, %242 : vector<2x32xf32>
    %244 = arith.negf %243 : vector<2x32xf32>
    %245 = math.exp %244 : vector<2x32xf32>
    %cst_63 = arith.constant 1.000000e+00 : f32
    %246 = vector.broadcast %cst_63 : f32 to vector<2x32xf32>
    %247 = arith.addf %246, %245 : vector<2x32xf32>
    %248 = arith.divf %246, %247 : vector<2x32xf32>
    %249 = vector.extract_strided_slice %240 {offsets = [0, 32], sizes = [2, 32], strides = [1, 1]} : vector<2x96xf32> to vector<2x32xf32>
    %250 = vector.extract_strided_slice %236 {offsets = [0, 32], sizes = [2, 32], strides = [1, 1]} : vector<2x96xf32> to vector<2x32xf32>
    %251 = arith.addf %249, %250 : vector<2x32xf32>
    %252 = arith.negf %251 : vector<2x32xf32>
    %253 = math.exp %252 : vector<2x32xf32>
    %cst_64 = arith.constant 1.000000e+00 : f32
    %254 = vector.broadcast %cst_64 : f32 to vector<2x32xf32>
    %255 = arith.addf %254, %253 : vector<2x32xf32>
    %256 = arith.divf %254, %255 : vector<2x32xf32>
    %257 = vector.extract_strided_slice %240 {offsets = [0, 64], sizes = [2, 32], strides = [1, 1]} : vector<2x96xf32> to vector<2x32xf32>
    %258 = vector.extract_strided_slice %236 {offsets = [0, 64], sizes = [2, 32], strides = [1, 1]} : vector<2x96xf32> to vector<2x32xf32>
    %259 = arith.addf %258, %10 : vector<2x32xf32>
    %260 = arith.mulf %248, %259 : vector<2x32xf32>
    %261 = arith.addf %257, %260 : vector<2x32xf32>
    %262 = math.tanh %261 : vector<2x32xf32>
    %cst_65 = arith.constant 1.000000e+00 : f32
    %263 = vector.broadcast %cst_65 : f32 to vector<2x32xf32>
    %264 = arith.subf %263, %256 : vector<2x32xf32>
    %265 = arith.mulf %264, %262 : vector<2x32xf32>
    %266 = arith.mulf %256, %233 : vector<2x32xf32>
    %267 = arith.addf %265, %266 : vector<2x32xf32>
    %268 = arith.index_cast %238 : i32 to index
    %c0_66 = arith.constant 0 : index
    %269 = vector.load %arg13[%268, %c0_66] : memref<16x32xf32, #tpu.memory_space<vmem>>, vector<2x32xf32>
    tpu.vector_store %arg13[%268, %c0_66], %267 {strides = array<i32>} : memref<16x32xf32, #tpu.memory_space<vmem>>, vector<2x32xf32>,
    %c7_i32_67 = arith.constant 7 : i32
    %c0_68 = arith.constant 0 : index
    %c0_69 = arith.constant 0 : index
    %270 = vector.load %arg13[%c0_68, %c0_69] : memref<16x32xf32, #tpu.memory_space<vmem>>, vector<16x32xf32>
    %c0_70 = arith.constant 0 : index
    %c0_71 = arith.constant 0 : index
    %271 = vector.load %arg5[%c0_70, %c0_71] : memref<32x96xf32, #tpu.memory_space<vmem>>, vector<32x96xf32>
    %cst_72 = arith.constant dense<0.000000e+00> : vector<16x96xf32>
    %272 = tpu.matmul %270, %271, %cst_72 {dimension_numbers = #tpu.dot_dimension_numbers<[1], [0], [0], [1], [0, 0, 1, 1], [], []>} : vector<16x32xf32>, vector<32x96xf32>, vector<16x96xf32> -> vector<16x96xf32>
    %c0_73 = arith.constant 0 : index
    %c0_74 = arith.constant 0 : index
    %273 = vector.load %arg7[%c0_73, %c0_74] : memref<1x96xf32, #tpu.memory_space<vmem>>, vector<1x96xf32>
    %274 = vector.broadcast %273 : vector<1x96xf32> to vector<16x96xf32>
    %275 = arith.addf %272, %274 : vector<16x96xf32>
    %c0_75 = arith.constant 0 : index
    %c0_76 = arith.constant 0 : index
    %276 = vector.load %arg12[%c0_75, %c0_76] : memref<16x96xf32, #tpu.memory_space<vmem>>, vector<16x96xf32>
    tpu.vector_store %arg12[%c0_75, %c0_76], %275 {strides = array<i32>} : memref<16x96xf32, #tpu.memory_space<vmem>>, vector<16x96xf32>,
    %c0_77 = arith.constant 0 : index
    %c0_78 = arith.constant 0 : index
    %277 = vector.load %arg6[%c0_77, %c0_78] : memref<32x96xf32, #tpu.memory_space<vmem>>, vector<32x96xf32>
    %c0_79 = arith.constant 0 : index
    %c0_80 = arith.constant 0 : index
    %278 = vector.load %arg8[%c0_79, %c0_80] : memref<1x32xf32, #tpu.memory_space<vmem>>, vector<1x32xf32>
    %279 = vector.shape_cast %278 : vector<1x32xf32> to vector<1x32xf32>
    %280 = vector.broadcast %279 : vector<1x32xf32> to vector<2x32xf32>
    %c0_81 = arith.constant 0 : index
    %c0_82 = arith.constant 0 : index
    %281 = vector.load %arg12[%c0_81, %c0_82] : memref<16x96xf32, #tpu.memory_space<vmem>>, vector<2x96xf32>
    %282 = vector.extract_strided_slice %281 {offsets = [0, 0], sizes = [2, 32], strides = [1, 1]} : vector<2x96xf32> to vector<2x32xf32>
    %283 = arith.negf %282 : vector<2x32xf32>
    %284 = math.exp %283 : vector<2x32xf32>
    %cst_83 = arith.constant 1.000000e+00 : f32
    %285 = vector.broadcast %cst_83 : f32 to vector<2x32xf32>
    %286 = arith.addf %285, %284 : vector<2x32xf32>
    %287 = arith.divf %285, %286 : vector<2x32xf32>
    %288 = vector.extract_strided_slice %281 {offsets = [0, 32], sizes = [2, 32], strides = [1, 1]} : vector<2x96xf32> to vector<2x32xf32>
    %289 = arith.negf %288 : vector<2x32xf32>
    %290 = math.exp %289 : vector<2x32xf32>
    %cst_84 = arith.constant 1.000000e+00 : f32
    %291 = vector.broadcast %cst_84 : f32 to vector<2x32xf32>
    %292 = arith.addf %291, %290 : vector<2x32xf32>
    %293 = arith.divf %291, %292 : vector<2x32xf32>
    %294 = vector.extract_strided_slice %281 {offsets = [0, 64], sizes = [2, 32], strides = [1, 1]} : vector<2x96xf32> to vector<2x32xf32>
    %295 = arith.mulf %287, %280 : vector<2x32xf32>
    %296 = arith.addf %294, %295 : vector<2x32xf32>
    %297 = math.tanh %296 : vector<2x32xf32>
    %cst_85 = arith.constant 1.000000e+00 : f32
    %298 = vector.broadcast %cst_85 : f32 to vector<2x32xf32>
    %299 = arith.subf %298, %293 : vector<2x32xf32>
    %300 = arith.mulf %299, %297 : vector<2x32xf32>
    %c1_i32_86 = arith.constant 1 : i32
    %cst_87 = arith.constant dense<0.000000e+00> : vector<2x96xf32>
    %301 = tpu.matmul %300, %277, %cst_87 {dimension_numbers = #tpu.dot_dimension_numbers<[1], [0], [0], [1], [0, 0, 1, 1], [], []>} : vector<2x32xf32>, vector<32x96xf32>, vector<2x96xf32> -> vector<2x96xf32>
    %c2_i32_88 = arith.constant 2 : i32
    %302 = arith.muli %c1_i32_86, %c2_i32_88 : i32
    %303 = tpu.assume_multiple %302, 2 : i32
    %304 = arith.index_cast %303 : i32 to index
    %c0_89 = arith.constant 0 : index
    %305 = vector.load %arg12[%304, %c0_89] : memref<16x96xf32, #tpu.memory_space<vmem>>, vector<2x96xf32>
    %306 = vector.extract_strided_slice %305 {offsets = [0, 0], sizes = [2, 32], strides = [1, 1]} : vector<2x96xf32> to vector<2x32xf32>
    %307 = vector.extract_strided_slice %301 {offsets = [0, 0], sizes = [2, 32], strides = [1, 1]} : vector<2x96xf32> to vector<2x32xf32>
    %308 = arith.addf %306, %307 : vector<2x32xf32>
    %309 = arith.negf %308 : vector<2x32xf32>
    %310 = math.exp %309 : vector<2x32xf32>
    %cst_90 = arith.constant 1.000000e+00 : f32
    %311 = vector.broadcast %cst_90 : f32 to vector<2x32xf32>
    %312 = arith.addf %311, %310 : vector<2x32xf32>
    %313 = arith.divf %311, %312 : vector<2x32xf32>
    %314 = vector.extract_strided_slice %305 {offsets = [0, 32], sizes = [2, 32], strides = [1, 1]} : vector<2x96xf32> to vector<2x32xf32>
    %315 = vector.extract_strided_slice %301 {offsets = [0, 32], sizes = [2, 32], strides = [1, 1]} : vector<2x96xf32> to vector<2x32xf32>
    %316 = arith.addf %314, %315 : vector<2x32xf32>
    %317 = arith.negf %316 : vector<2x32xf32>
    %318 = math.exp %317 : vector<2x32xf32>
    %cst_91 = arith.constant 1.000000e+00 : f32
    %319 = vector.broadcast %cst_91 : f32 to vector<2x32xf32>
    %320 = arith.addf %319, %318 : vector<2x32xf32>
    %321 = arith.divf %319, %320 : vector<2x32xf32>
    %322 = vector.extract_strided_slice %305 {offsets = [0, 64], sizes = [2, 32], strides = [1, 1]} : vector<2x96xf32> to vector<2x32xf32>
    %323 = vector.extract_strided_slice %301 {offsets = [0, 64], sizes = [2, 32], strides = [1, 1]} : vector<2x96xf32> to vector<2x32xf32>
    %324 = arith.addf %323, %280 : vector<2x32xf32>
    %325 = arith.mulf %313, %324 : vector<2x32xf32>
    %326 = arith.addf %322, %325 : vector<2x32xf32>
    %327 = math.tanh %326 : vector<2x32xf32>
    %cst_92 = arith.constant 1.000000e+00 : f32
    %328 = vector.broadcast %cst_92 : f32 to vector<2x32xf32>
    %329 = arith.subf %328, %321 : vector<2x32xf32>
    %330 = arith.mulf %329, %327 : vector<2x32xf32>
    %331 = arith.mulf %321, %300 : vector<2x32xf32>
    %332 = arith.addf %330, %331 : vector<2x32xf32>
    %c2_i32_93 = arith.constant 2 : i32
    %cst_94 = arith.constant dense<0.000000e+00> : vector<2x96xf32>
    %333 = tpu.matmul %332, %277, %cst_94 {dimension_numbers = #tpu.dot_dimension_numbers<[1], [0], [0], [1], [0, 0, 1, 1], [], []>} : vector<2x32xf32>, vector<32x96xf32>, vector<2x96xf32> -> vector<2x96xf32>
    %c2_i32_95 = arith.constant 2 : i32
    %334 = arith.muli %c2_i32_93, %c2_i32_95 : i32
    %335 = tpu.assume_multiple %334, 2 : i32
    %336 = arith.index_cast %335 : i32 to index
    %c0_96 = arith.constant 0 : index
    %337 = vector.load %arg12[%336, %c0_96] : memref<16x96xf32, #tpu.memory_space<vmem>>, vector<2x96xf32>
    %338 = vector.extract_strided_slice %337 {offsets = [0, 0], sizes = [2, 32], strides = [1, 1]} : vector<2x96xf32> to vector<2x32xf32>
    %339 = vector.extract_strided_slice %333 {offsets = [0, 0], sizes = [2, 32], strides = [1, 1]} : vector<2x96xf32> to vector<2x32xf32>
    %340 = arith.addf %338, %339 : vector<2x32xf32>
    %341 = arith.negf %340 : vector<2x32xf32>
    %342 = math.exp %341 : vector<2x32xf32>
    %cst_97 = arith.constant 1.000000e+00 : f32
    %343 = vector.broadcast %cst_97 : f32 to vector<2x32xf32>
    %344 = arith.addf %343, %342 : vector<2x32xf32>
    %345 = arith.divf %343, %344 : vector<2x32xf32>
    %346 = vector.extract_strided_slice %337 {offsets = [0, 32], sizes = [2, 32], strides = [1, 1]} : vector<2x96xf32> to vector<2x32xf32>
    %347 = vector.extract_strided_slice %333 {offsets = [0, 32], sizes = [2, 32], strides = [1, 1]} : vector<2x96xf32> to vector<2x32xf32>
    %348 = arith.addf %346, %347 : vector<2x32xf32>
    %349 = arith.negf %348 : vector<2x32xf32>
    %350 = math.exp %349 : vector<2x32xf32>
    %cst_98 = arith.constant 1.000000e+00 : f32
    %351 = vector.broadcast %cst_98 : f32 to vector<2x32xf32>
    %352 = arith.addf %351, %350 : vector<2x32xf32>
    %353 = arith.divf %351, %352 : vector<2x32xf32>
    %354 = vector.extract_strided_slice %337 {offsets = [0, 64], sizes = [2, 32], strides = [1, 1]} : vector<2x96xf32> to vector<2x32xf32>
    %355 = vector.extract_strided_slice %333 {offsets = [0, 64], sizes = [2, 32], strides = [1, 1]} : vector<2x96xf32> to vector<2x32xf32>
    %356 = arith.addf %355, %280 : vector<2x32xf32>
    %357 = arith.mulf %345, %356 : vector<2x32xf32>
    %358 = arith.addf %354, %357 : vector<2x32xf32>
    %359 = math.tanh %358 : vector<2x32xf32>
    %cst_99 = arith.constant 1.000000e+00 : f32
    %360 = vector.broadcast %cst_99 : f32 to vector<2x32xf32>
    %361 = arith.subf %360, %353 : vector<2x32xf32>
    %362 = arith.mulf %361, %359 : vector<2x32xf32>
    %363 = arith.mulf %353, %332 : vector<2x32xf32>
    %364 = arith.addf %362, %363 : vector<2x32xf32>
    %c3_i32_100 = arith.constant 3 : i32
    %cst_101 = arith.constant dense<0.000000e+00> : vector<2x96xf32>
    %365 = tpu.matmul %364, %277, %cst_101 {dimension_numbers = #tpu.dot_dimension_numbers<[1], [0], [0], [1], [0, 0, 1, 1], [], []>} : vector<2x32xf32>, vector<32x96xf32>, vector<2x96xf32> -> vector<2x96xf32>
    %c2_i32_102 = arith.constant 2 : i32
    %366 = arith.muli %c3_i32_100, %c2_i32_102 : i32
    %367 = tpu.assume_multiple %366, 2 : i32
    %368 = arith.index_cast %367 : i32 to index
    %c0_103 = arith.constant 0 : index
    %369 = vector.load %arg12[%368, %c0_103] : memref<16x96xf32, #tpu.memory_space<vmem>>, vector<2x96xf32>
    %370 = vector.extract_strided_slice %369 {offsets = [0, 0], sizes = [2, 32], strides = [1, 1]} : vector<2x96xf32> to vector<2x32xf32>
    %371 = vector.extract_strided_slice %365 {offsets = [0, 0], sizes = [2, 32], strides = [1, 1]} : vector<2x96xf32> to vector<2x32xf32>
    %372 = arith.addf %370, %371 : vector<2x32xf32>
    %373 = arith.negf %372 : vector<2x32xf32>
    %374 = math.exp %373 : vector<2x32xf32>
    %cst_104 = arith.constant 1.000000e+00 : f32
    %375 = vector.broadcast %cst_104 : f32 to vector<2x32xf32>
    %376 = arith.addf %375, %374 : vector<2x32xf32>
    %377 = arith.divf %375, %376 : vector<2x32xf32>
    %378 = vector.extract_strided_slice %369 {offsets = [0, 32], sizes = [2, 32], strides = [1, 1]} : vector<2x96xf32> to vector<2x32xf32>
    %379 = vector.extract_strided_slice %365 {offsets = [0, 32], sizes = [2, 32], strides = [1, 1]} : vector<2x96xf32> to vector<2x32xf32>
    %380 = arith.addf %378, %379 : vector<2x32xf32>
    %381 = arith.negf %380 : vector<2x32xf32>
    %382 = math.exp %381 : vector<2x32xf32>
    %cst_105 = arith.constant 1.000000e+00 : f32
    %383 = vector.broadcast %cst_105 : f32 to vector<2x32xf32>
    %384 = arith.addf %383, %382 : vector<2x32xf32>
    %385 = arith.divf %383, %384 : vector<2x32xf32>
    %386 = vector.extract_strided_slice %369 {offsets = [0, 64], sizes = [2, 32], strides = [1, 1]} : vector<2x96xf32> to vector<2x32xf32>
    %387 = vector.extract_strided_slice %365 {offsets = [0, 64], sizes = [2, 32], strides = [1, 1]} : vector<2x96xf32> to vector<2x32xf32>
    %388 = arith.addf %387, %280 : vector<2x32xf32>
    %389 = arith.mulf %377, %388 : vector<2x32xf32>
    %390 = arith.addf %386, %389 : vector<2x32xf32>
    %391 = math.tanh %390 : vector<2x32xf32>
    %cst_106 = arith.constant 1.000000e+00 : f32
    %392 = vector.broadcast %cst_106 : f32 to vector<2x32xf32>
    %393 = arith.subf %392, %385 : vector<2x32xf32>
    %394 = arith.mulf %393, %391 : vector<2x32xf32>
    %395 = arith.mulf %385, %364 : vector<2x32xf32>
    %396 = arith.addf %394, %395 : vector<2x32xf32>
    %c4_i32_107 = arith.constant 4 : i32
    %cst_108 = arith.constant dense<0.000000e+00> : vector<2x96xf32>
    %397 = tpu.matmul %396, %277, %cst_108 {dimension_numbers = #tpu.dot_dimension_numbers<[1], [0], [0], [1], [0, 0, 1, 1], [], []>} : vector<2x32xf32>, vector<32x96xf32>, vector<2x96xf32> -> vector<2x96xf32>
    %c2_i32_109 = arith.constant 2 : i32
    %398 = arith.muli %c4_i32_107, %c2_i32_109 : i32
    %399 = tpu.assume_multiple %398, 2 : i32
    %400 = arith.index_cast %399 : i32 to index
    %c0_110 = arith.constant 0 : index
    %401 = vector.load %arg12[%400, %c0_110] : memref<16x96xf32, #tpu.memory_space<vmem>>, vector<2x96xf32>
    %402 = vector.extract_strided_slice %401 {offsets = [0, 0], sizes = [2, 32], strides = [1, 1]} : vector<2x96xf32> to vector<2x32xf32>
    %403 = vector.extract_strided_slice %397 {offsets = [0, 0], sizes = [2, 32], strides = [1, 1]} : vector<2x96xf32> to vector<2x32xf32>
    %404 = arith.addf %402, %403 : vector<2x32xf32>
    %405 = arith.negf %404 : vector<2x32xf32>
    %406 = math.exp %405 : vector<2x32xf32>
    %cst_111 = arith.constant 1.000000e+00 : f32
    %407 = vector.broadcast %cst_111 : f32 to vector<2x32xf32>
    %408 = arith.addf %407, %406 : vector<2x32xf32>
    %409 = arith.divf %407, %408 : vector<2x32xf32>
    %410 = vector.extract_strided_slice %401 {offsets = [0, 32], sizes = [2, 32], strides = [1, 1]} : vector<2x96xf32> to vector<2x32xf32>
    %411 = vector.extract_strided_slice %397 {offsets = [0, 32], sizes = [2, 32], strides = [1, 1]} : vector<2x96xf32> to vector<2x32xf32>
    %412 = arith.addf %410, %411 : vector<2x32xf32>
    %413 = arith.negf %412 : vector<2x32xf32>
    %414 = math.exp %413 : vector<2x32xf32>
    %cst_112 = arith.constant 1.000000e+00 : f32
    %415 = vector.broadcast %cst_112 : f32 to vector<2x32xf32>
    %416 = arith.addf %415, %414 : vector<2x32xf32>
    %417 = arith.divf %415, %416 : vector<2x32xf32>
    %418 = vector.extract_strided_slice %401 {offsets = [0, 64], sizes = [2, 32], strides = [1, 1]} : vector<2x96xf32> to vector<2x32xf32>
    %419 = vector.extract_strided_slice %397 {offsets = [0, 64], sizes = [2, 32], strides = [1, 1]} : vector<2x96xf32> to vector<2x32xf32>
    %420 = arith.addf %419, %280 : vector<2x32xf32>
    %421 = arith.mulf %409, %420 : vector<2x32xf32>
    %422 = arith.addf %418, %421 : vector<2x32xf32>
    %423 = math.tanh %422 : vector<2x32xf32>
    %cst_113 = arith.constant 1.000000e+00 : f32
    %424 = vector.broadcast %cst_113 : f32 to vector<2x32xf32>
    %425 = arith.subf %424, %417 : vector<2x32xf32>
    %426 = arith.mulf %425, %423 : vector<2x32xf32>
    %427 = arith.mulf %417, %396 : vector<2x32xf32>
    %428 = arith.addf %426, %427 : vector<2x32xf32>
    %c5_i32_114 = arith.constant 5 : i32
    %cst_115 = arith.constant dense<0.000000e+00> : vector<2x96xf32>
    %429 = tpu.matmul %428, %277, %cst_115 {dimension_numbers = #tpu.dot_dimension_numbers<[1], [0], [0], [1], [0, 0, 1, 1], [], []>} : vector<2x32xf32>, vector<32x96xf32>, vector<2x96xf32> -> vector<2x96xf32>
    %c2_i32_116 = arith.constant 2 : i32
    %430 = arith.muli %c5_i32_114, %c2_i32_116 : i32
    %431 = tpu.assume_multiple %430, 2 : i32
    %432 = arith.index_cast %431 : i32 to index
    %c0_117 = arith.constant 0 : index
    %433 = vector.load %arg12[%432, %c0_117] : memref<16x96xf32, #tpu.memory_space<vmem>>, vector<2x96xf32>
    %434 = vector.extract_strided_slice %433 {offsets = [0, 0], sizes = [2, 32], strides = [1, 1]} : vector<2x96xf32> to vector<2x32xf32>
    %435 = vector.extract_strided_slice %429 {offsets = [0, 0], sizes = [2, 32], strides = [1, 1]} : vector<2x96xf32> to vector<2x32xf32>
    %436 = arith.addf %434, %435 : vector<2x32xf32>
    %437 = arith.negf %436 : vector<2x32xf32>
    %438 = math.exp %437 : vector<2x32xf32>
    %cst_118 = arith.constant 1.000000e+00 : f32
    %439 = vector.broadcast %cst_118 : f32 to vector<2x32xf32>
    %440 = arith.addf %439, %438 : vector<2x32xf32>
    %441 = arith.divf %439, %440 : vector<2x32xf32>
    %442 = vector.extract_strided_slice %433 {offsets = [0, 32], sizes = [2, 32], strides = [1, 1]} : vector<2x96xf32> to vector<2x32xf32>
    %443 = vector.extract_strided_slice %429 {offsets = [0, 32], sizes = [2, 32], strides = [1, 1]} : vector<2x96xf32> to vector<2x32xf32>
    %444 = arith.addf %442, %443 : vector<2x32xf32>
    %445 = arith.negf %444 : vector<2x32xf32>
    %446 = math.exp %445 : vector<2x32xf32>
    %cst_119 = arith.constant 1.000000e+00 : f32
    %447 = vector.broadcast %cst_119 : f32 to vector<2x32xf32>
    %448 = arith.addf %447, %446 : vector<2x32xf32>
    %449 = arith.divf %447, %448 : vector<2x32xf32>
    %450 = vector.extract_strided_slice %433 {offsets = [0, 64], sizes = [2, 32], strides = [1, 1]} : vector<2x96xf32> to vector<2x32xf32>
    %451 = vector.extract_strided_slice %429 {offsets = [0, 64], sizes = [2, 32], strides = [1, 1]} : vector<2x96xf32> to vector<2x32xf32>
    %452 = arith.addf %451, %280 : vector<2x32xf32>
    %453 = arith.mulf %441, %452 : vector<2x32xf32>
    %454 = arith.addf %450, %453 : vector<2x32xf32>
    %455 = math.tanh %454 : vector<2x32xf32>
    %cst_120 = arith.constant 1.000000e+00 : f32
    %456 = vector.broadcast %cst_120 : f32 to vector<2x32xf32>
    %457 = arith.subf %456, %449 : vector<2x32xf32>
    %458 = arith.mulf %457, %455 : vector<2x32xf32>
    %459 = arith.mulf %449, %428 : vector<2x32xf32>
    %460 = arith.addf %458, %459 : vector<2x32xf32>
    %c6_i32_121 = arith.constant 6 : i32
    %cst_122 = arith.constant dense<0.000000e+00> : vector<2x96xf32>
    %461 = tpu.matmul %460, %277, %cst_122 {dimension_numbers = #tpu.dot_dimension_numbers<[1], [0], [0], [1], [0, 0, 1, 1], [], []>} : vector<2x32xf32>, vector<32x96xf32>, vector<2x96xf32> -> vector<2x96xf32>
    %c2_i32_123 = arith.constant 2 : i32
    %462 = arith.muli %c6_i32_121, %c2_i32_123 : i32
    %463 = tpu.assume_multiple %462, 2 : i32
    %464 = arith.index_cast %463 : i32 to index
    %c0_124 = arith.constant 0 : index
    %465 = vector.load %arg12[%464, %c0_124] : memref<16x96xf32, #tpu.memory_space<vmem>>, vector<2x96xf32>
    %466 = vector.extract_strided_slice %465 {offsets = [0, 0], sizes = [2, 32], strides = [1, 1]} : vector<2x96xf32> to vector<2x32xf32>
    %467 = vector.extract_strided_slice %461 {offsets = [0, 0], sizes = [2, 32], strides = [1, 1]} : vector<2x96xf32> to vector<2x32xf32>
    %468 = arith.addf %466, %467 : vector<2x32xf32>
    %469 = arith.negf %468 : vector<2x32xf32>
    %470 = math.exp %469 : vector<2x32xf32>
    %cst_125 = arith.constant 1.000000e+00 : f32
    %471 = vector.broadcast %cst_125 : f32 to vector<2x32xf32>
    %472 = arith.addf %471, %470 : vector<2x32xf32>
    %473 = arith.divf %471, %472 : vector<2x32xf32>
    %474 = vector.extract_strided_slice %465 {offsets = [0, 32], sizes = [2, 32], strides = [1, 1]} : vector<2x96xf32> to vector<2x32xf32>
    %475 = vector.extract_strided_slice %461 {offsets = [0, 32], sizes = [2, 32], strides = [1, 1]} : vector<2x96xf32> to vector<2x32xf32>
    %476 = arith.addf %474, %475 : vector<2x32xf32>
    %477 = arith.negf %476 : vector<2x32xf32>
    %478 = math.exp %477 : vector<2x32xf32>
    %cst_126 = arith.constant 1.000000e+00 : f32
    %479 = vector.broadcast %cst_126 : f32 to vector<2x32xf32>
    %480 = arith.addf %479, %478 : vector<2x32xf32>
    %481 = arith.divf %479, %480 : vector<2x32xf32>
    %482 = vector.extract_strided_slice %465 {offsets = [0, 64], sizes = [2, 32], strides = [1, 1]} : vector<2x96xf32> to vector<2x32xf32>
    %483 = vector.extract_strided_slice %461 {offsets = [0, 64], sizes = [2, 32], strides = [1, 1]} : vector<2x96xf32> to vector<2x32xf32>
    %484 = arith.addf %483, %280 : vector<2x32xf32>
    %485 = arith.mulf %473, %484 : vector<2x32xf32>
    %486 = arith.addf %482, %485 : vector<2x32xf32>
    %487 = math.tanh %486 : vector<2x32xf32>
    %cst_127 = arith.constant 1.000000e+00 : f32
    %488 = vector.broadcast %cst_127 : f32 to vector<2x32xf32>
    %489 = arith.subf %488, %481 : vector<2x32xf32>
    %490 = arith.mulf %489, %487 : vector<2x32xf32>
    %491 = arith.mulf %481, %460 : vector<2x32xf32>
    %492 = arith.addf %490, %491 : vector<2x32xf32>
    %c7_i32_128 = arith.constant 7 : i32
    %cst_129 = arith.constant dense<0.000000e+00> : vector<2x96xf32>
    %493 = tpu.matmul %492, %277, %cst_129 {dimension_numbers = #tpu.dot_dimension_numbers<[1], [0], [0], [1], [0, 0, 1, 1], [], []>} : vector<2x32xf32>, vector<32x96xf32>, vector<2x96xf32> -> vector<2x96xf32>
    %c2_i32_130 = arith.constant 2 : i32
    %494 = arith.muli %c7_i32_128, %c2_i32_130 : i32
    %495 = tpu.assume_multiple %494, 2 : i32
    %496 = arith.index_cast %495 : i32 to index
    %c0_131 = arith.constant 0 : index
    %497 = vector.load %arg12[%496, %c0_131] : memref<16x96xf32, #tpu.memory_space<vmem>>, vector<2x96xf32>
    %498 = vector.extract_strided_slice %497 {offsets = [0, 0], sizes = [2, 32], strides = [1, 1]} : vector<2x96xf32> to vector<2x32xf32>
    %499 = vector.extract_strided_slice %493 {offsets = [0, 0], sizes = [2, 32], strides = [1, 1]} : vector<2x96xf32> to vector<2x32xf32>
    %500 = arith.addf %498, %499 : vector<2x32xf32>
    %501 = arith.negf %500 : vector<2x32xf32>
    %502 = math.exp %501 : vector<2x32xf32>
    %cst_132 = arith.constant 1.000000e+00 : f32
    %503 = vector.broadcast %cst_132 : f32 to vector<2x32xf32>
    %504 = arith.addf %503, %502 : vector<2x32xf32>
    %505 = arith.divf %503, %504 : vector<2x32xf32>
    %506 = vector.extract_strided_slice %497 {offsets = [0, 32], sizes = [2, 32], strides = [1, 1]} : vector<2x96xf32> to vector<2x32xf32>
    %507 = vector.extract_strided_slice %493 {offsets = [0, 32], sizes = [2, 32], strides = [1, 1]} : vector<2x96xf32> to vector<2x32xf32>
    %508 = arith.addf %506, %507 : vector<2x32xf32>
    %509 = arith.negf %508 : vector<2x32xf32>
    %510 = math.exp %509 : vector<2x32xf32>
    %cst_133 = arith.constant 1.000000e+00 : f32
    %511 = vector.broadcast %cst_133 : f32 to vector<2x32xf32>
    %512 = arith.addf %511, %510 : vector<2x32xf32>
    %513 = arith.divf %511, %512 : vector<2x32xf32>
    %514 = vector.extract_strided_slice %497 {offsets = [0, 64], sizes = [2, 32], strides = [1, 1]} : vector<2x96xf32> to vector<2x32xf32>
    %515 = vector.extract_strided_slice %493 {offsets = [0, 64], sizes = [2, 32], strides = [1, 1]} : vector<2x96xf32> to vector<2x32xf32>
    %516 = arith.addf %515, %280 : vector<2x32xf32>
    %517 = arith.mulf %505, %516 : vector<2x32xf32>
    %518 = arith.addf %514, %517 : vector<2x32xf32>
    %519 = math.tanh %518 : vector<2x32xf32>
    %cst_134 = arith.constant 1.000000e+00 : f32
    %520 = vector.broadcast %cst_134 : f32 to vector<2x32xf32>
    %521 = arith.subf %520, %513 : vector<2x32xf32>
    %522 = arith.mulf %521, %519 : vector<2x32xf32>
    %523 = arith.mulf %513, %492 : vector<2x32xf32>
    %524 = arith.addf %522, %523 : vector<2x32xf32>
    %c7_i32_135 = arith.constant 7 : i32
    %cst_136 = arith.constant 0.000000e+00 : f32
    %525 = vector.broadcast %cst_136 : f32 to vector<2x32xf32>
    %526 = arith.maximumf %524, %525 : vector<2x32xf32>
    %c0_137 = arith.constant 0 : index
    %c0_138 = arith.constant 0 : index
    %527 = vector.load %arg9[%c0_137, %c0_138] : memref<32x8xf32, #tpu.memory_space<vmem>>, vector<32x8xf32>
    %cst_139 = arith.constant dense<0.000000e+00> : vector<2x8xf32>
    %528 = tpu.matmul %526, %527, %cst_139 {dimension_numbers = #tpu.dot_dimension_numbers<[1], [0], [0], [1], [0, 0, 1, 1], [], []>} : vector<2x32xf32>, vector<32x8xf32>, vector<2x8xf32> -> vector<2x8xf32>
    %c0_140 = arith.constant 0 : index
    %c0_141 = arith.constant 0 : index
    %529 = vector.load %arg10[%c0_140, %c0_141] : memref<1x8xf32, #tpu.memory_space<vmem>>, vector<1x8xf32>
    %530 = vector.broadcast %529 : vector<1x8xf32> to vector<2x8xf32>
    %531 = arith.addf %528, %530 : vector<2x8xf32>
    %c0_142 = arith.constant 0 : index
    %c0_143 = arith.constant 0 : index
    %532 = vector.load %arg11[%c0_142, %c0_143] : memref<2x8xf32, #tpu.memory_space<vmem>>, vector<2x8xf32>
    tpu.vector_store %arg11[%c0_142, %c0_143], %531 {strides = array<i32>} : memref<2x8xf32, #tpu.memory_space<vmem>>, vector<2x8xf32>,
    return
  }
}

</mosaic_0001>

<bundles_post_ra>
// kernel: tpu_custom_call.1
= control target key start
LH: loop header
LB: loop body
LE: loop exit
PB: predicated region body
PF: predicated region fallthrough
CT: control target
= control target key end

     0   :  { %16 = vsyncpa [#allocation5], 0  ;;  %s2869_s0 = inlined_call_operand.vmem [shape: f32[16,4], index: 0, kind: input, shape index: {}]   ;;  %s2870_s1 = inlined_call_operand.hbm [shape: f32[4,96], index: 1, kind: input, shape index: {}]   ;;  %s2871_s2 = inlined_call_operand.vmem [shape: f32[32,96], index: 2, kind: input, shape index: {}]   ;;  %s2872_s3 = inlined_call_operand.vmem [shape: f32[1,96], index: 3, kind: input, shape index: {}]   ;;  %s2873_s4 = inlined_call_operand.vmem [shape: f32[1,32], index: 4, kind: input, shape index: {}]   ;;  %s2874_s5 = inlined_call_operand.vmem [shape: f32[32,96], index: 5, kind: input, shape index: {}]   ;;  %s2875_s6 = inlined_call_operand.hbm [shape: f32[32,96], index: 6, kind: input, shape index: {}]   ;;  %s2876_s7 = inlined_call_operand.vmem [shape: f32[1,96], index: 7, kind: input, shape index: {}]   ;;  %s2877_s8 = inlined_call_operand.vmem [shape: f32[1,32], index: 8, kind: input, shape index: {}]   ;;  %s2878_s9 = inlined_call_operand.vmem [shape: f32[32,8], index: 9, kind: input, shape index: {}]   ;;  %s2879_s10 = inlined_call_operand.vmem [shape: f32[1,8], index: 10, kind: input, shape index: {}]   ;;  %s2880_s11 = inlined_call_operand.hbm [shape: f32[2,8], index: 11, kind: output, shape index: {}]  }
   0x1   :  { %17 = vsyncpa [#allocation8], 0 }
   0x2   :  { %18 = vsyncpa [#allocation6], 0  ;;  %s2492_s17 = smov [#allocation4]   ;;  %s2493_s19 = smov [#allocation7]  }
   0x3   :  { %s27_s18 = sshll.u32 %s2492_s17, 4  ;;  %s44_s20 = sshll.u32 %s2493_s19, 4  ;;  %s28_s18 = int_to_ptr.vmem [resolvable:$true] %s27_s18  ;;  %s2562_s20 = int_to_ptr.vmem [resolvable:$true] %s44_s20 }
   0x4   :  { %s2420_s23 = scalar_lea.hbm %s2870_s1, 64 }
   0x5   :  { %p2421_p0 = scmp.ne.s32.totalorder %s2870_s1, %s2420_s23  ;;  %p2424_p1 = scmp.lt.u32.totalorder %s2420_s23, %s2870_s1 }
   0x7   :  { %p2426_p2 = pnand %p2424_p1, %p2421_p0 }
   0x9   :  { %2429 = shalt.err (!%p2426_p2)
}
   0xa   :  { %s2430_s28 = scalar_lea.vmem %s28_s18, 64  ;;  %p2435_p4 = scmp.lt.s32.totalorder %s28_s18, %s28_s18 }
   0xb   :  { %p2431_p3 = scmp.ne.s32.totalorder %s28_s18, %s2430_s28  ;;  %p2436_p5 = scmp.lt.s32.totalorder %s2430_s28, %s2430_s28 }
   0xd   :  { %p2437_p6 = por %p2436_p5, %p2435_p4 }
   0xf   :  { %p2438_p7 = pnand %p2437_p6, %p2431_p3 }
  0x11   :  { %2441 = shalt.err (!%p2438_p7)
}
  0x12   :  { %30 = dma.hbm_to_vmem [thread:$0]  %s2870_s1, 64, %s28_s18, [#allocation5]  }
  0x13   :  { %s2442_s14 = scalar_lea.hbm %s2875_s6, 512 }
  0x14   :  { %p2443_p8 = scmp.ne.s32.totalorder %s2875_s6, %s2442_s14  ;;  %p2446_p9 = scmp.lt.u32.totalorder %s2442_s14, %s2875_s6 }
  0x16   :  { %p2448_p10 = pnand %p2446_p9, %p2443_p8 }
  0x18   :  { %2451 = shalt.err (!%p2448_p10)
}
  0x19   :  { %s2452_s21 = scalar_lea.vmem %s2562_s20, 512  ;;  %p2457_p12 = scmp.lt.s32.totalorder %s2562_s20, %s2562_s20 }
  0x1a   :  { %p2453_p11 = scmp.ne.s32.totalorder %s2562_s20, %s2452_s21  ;;  %p2458_p13 = scmp.lt.s32.totalorder %s2452_s21, %s2452_s21 }
  0x1c   :  { %p2459_p0 = por %p2458_p13, %p2457_p12 }
  0x1e   :  { %p2460_p1 = pnand %p2459_p0, %p2453_p11 }
  0x20   :  { %2463 = shalt.err (!%p2460_p1)
}
  0x21   :  { %s2494_s1 = smov 128   ;;  %s2495_s18 = smov 8  }
  0x22   :  { %50 = dma.hbm_to_vmem [thread:$0]  %s2875_s6, 512, %s2562_s20, [#allocation8], %s2494_s1, %s2494_s1, %s2495_s18  }
  0x23   :  { %2486 = dma.done.wait [#allocation5], 64  }
  0x24   :  { %2487 = vsyncadd [#allocation5], 4294967232 }
  0x25   :  { %2488 = dma.done.wait [#allocation8], 512  }
  0x26   :  { %2489 = vsyncadd [#allocation8], 4294966784  ;;  %vm82_vm0 = vcmask 1043456   ;;  %vm75_vm1 = vcmask 31744   ;;  %v67_v0 = vld [vmem:[#allocation4] sm:$0xf] }
  0x27   :  { %v65_v1 = vld [vmem:[%s2869_s0] sm:$0xff]  ;;  %v66_v2 = vld [vmem:[%s2869_s0 + $0x8] sm:$0xff]  ;;  %2035 = vmatprep.subr.msk.mxu0 %vm82_vm0, %v67_v0  ;;  %vm161_vm2 = vcmask 785408   ;;  %v166_v19 = vld [vmem:[%s2871_s2 + $0x10] sm:$0xff]  ;;  %v2497_v20 = vmov 0.0|0.0   ;;  %vm2498_vm3 = vmmov 0  }
  0x28   :  { %2037 = vmatprep.mubr.msk.f32.mxu0 %vm75_vm1, %v65_v1  ;;  %2036 = vmatpush3.msk.msra.mxu0 %vm82_vm0, %v67_v0  ;;  %v1910_v3 = vld [vmem:[%s2872_s3] ss:$0 sm:$0xff]  ;;  %s2496_s3 = smov 64   ;;  %v165_v18 = vld [vmem:[%s2871_s2 + $0x8] sm:$0xff]  ;;  %v167_v22 = vld [vmem:[%s2871_s2 + $0x18] sm:$0xff]  ;;  %v2499_v23 = vmov 0.0  }
  0x29   :  { %2038 = vmatmul.mubr.msk.f32.vlgmr.msra.gmra.mrb[0].mxu0 %vm75_vm1, %v66_v2  ;;  %v1914_v12 = vld [vmem:[%s2873_s4] ss:$0 sm:$0xff]  ;;  %2216 = vmatprep.subr.bf16.mxu1 %v2497_v20  ;;  %v2629_v24 = vpack.c.bf16 %v167_v22, %v166_v19  ;;  %vm199_vm4 = vcmask 254976   ;;  %vm201_vm5 = vcmask 261120   ;;  %s2501_s12 = smov [#allocation9]   ;;  %vm1892_vm6 = vcmask 58368  }
  0x2a   :  { %v164_v17 = vld [vmem:[%s2871_s2] sm:$0xff]  ;;  %2048 = vmatprep.mubr.msk.f32.mxu1 %vm2498_vm3, %v2499_v23  ;;  %2222 = vmatprep.subr.bf16.mxu0 %v2497_v20  ;;  %s2500_s2 = smov 96   ;;  %s1900_s13 = sshll.u32 %s2501_s12, 4  ;;  %s1901_s13 = int_to_ptr.vmem [resolvable:$true] %s1900_s13 }
  0x2b   :  { %v2618_v21 = vpack.c.bf16 %v165_v18, %v164_v17  ;;  %2059 = vmatprep.mubr.msk.f32.mxu0 %vm2498_vm3, %v2499_v23  ;;  %s2464_s14 = scalar_lea.vmem %s1901_s13, 32  ;;  %p2469_p3 = scmp.lt.s32.totalorder %s1901_s13, %s1901_s13 }
  0x2c   :  { %p2465_p2 = scmp.ne.s32.totalorder %s1901_s13, %s2464_s14  ;;  %p2470_p4 = scmp.lt.s32.totalorder %s2464_s14, %s2464_s14 }
  0x2d   :  { %2218 = vmatpush3.bf16.msra.mxu1 %v2618_v21  ;;  %2224 = vmatpush3.bf16.msra.mxu0 %v2618_v21 }
  0x2e   :  { %2219 = vmatprep.subr.bf16.mxu1 %v2497_v20  ;;  %2225 = vmatprep.subr.bf16.mxu0 %v2497_v20  ;;  %p2471_p5 = por %p2470_p4, %p2469_p3 }
  0x30   :  { %p2472_p6 = pnand %p2471_p5, %p2465_p2 }
  0x31   :  { %2221 = vmatpush3.bf16.msra.mxu1 %v2629_v24  ;;  %2227 = vmatpush3.bf16.msra.mxu0 %v2629_v24 }
  0x32   :  { %2228 = vmatprep.subr.bf16.mxu1 %v2497_v20  ;;  %2234 = vmatprep.subr.bf16.mxu0 %v2497_v20 }
  0xfc   :  { %v2039_v4 = vpop.f32.mrb[0].mxu0 }
  0xfd   :  { %v158_v5 = vadd.f32 %v2039_v4, %v1910_v3  ;;  %v152_v6 = vpop.f32.mrb[1].mxu0 }
  0xfe   :  { %v153_v7 = vadd.f32 %v1910_v3, %v152_v6 }
  0xff   :  { %163 = vst.msk [vmem:[#allocation2 + $0x8] sm:$0xff] %vm161_vm2, %v158_v5 }
 0x100   :  { %162 = vst.msk [vmem:[#allocation2] sm:$0xff] %vm161_vm2, %v153_v7 }
 0x107   :  { %v175_v8 = vld [vmem:[#allocation2] sm:$0x3]  ;;  %v275_v34 = vld [vmem:[#allocation2 + $0x2] sm:$0x3]  ;;  %v385_v54 = vld [vmem:[#allocation2 + $0x4] sm:$0x3] }
 0x108   :  { %v1915_v9 = vmul.f32 -1.442695, %v175_v8 }
 0x10a   :  { %2324 = vpow2.f32 %v1915_v9 }
 0x114   :  { %v2325_v10 = vpop.eup %2324 }
 0x115   :  { %v179_v11 = vadd.f32 1.0, %v2325_v10  ;;  %v492_v10 = vld [vmem:[#allocation2 + $0x6] sm:$0x3] }
 0x117   :  { %2326 = vrcp.f32 %v179_v11 }
 0x121   :  { %v2327_v13 = vpop.eup %2326 }
 0x122   :  { %v182_v14 = vmul.f32 %v2327_v13, %v1914_v12  ;;  %v189_v26 = vsub.f32 1.0, %v2327_v13 }
 0x124   :  { %184 = vrot.lane.b32.xlu0 %v182_v14, %s2496_s3 }
 0x196   :  { %v185_v15 = vpop.permute.xlu0 %184 }
 0x197   :  { %v187_v16 = vadd.f32 %v185_v15, %v175_v8 }
 0x199   :  { %2328 = vtanh.f32 %v187_v16 }
 0x1a3   :  { %v2329_v25 = vpop.eup %2328 }
 0x1a4   :  { %191 = vrot.lane.b32.xlu0 %v2329_v25, %s2500_s2 }
 0x216   :  { %v192_v27 = vpop.permute.xlu0 %191 }
 0x217   :  { %v194_v28 = vmul.f32 %v192_v27, %v189_v26 }
 0x219   :  { %196 = vrot.lane.b32.xlu1 %v194_v28, %s2500_s2 }
 0x21d   :  { %283 = vrot.lane.b32.xlu1 %v1914_v12, %s2496_s3 }
 0x28b   :  { %v197_v29 = vpop.permute.xlu1 %196 }
 0x28c   :  { %200 = vst.msk [vmem:[#allocation3] sm:$0x3] %vm199_vm4, %v197_v29  ;;  %2049 = vmatmul.mubr.msk.f32.vlgmr.msra.gmra.mrb[0].mxu1 %vm201_vm5, %v197_v29 }
 0x28d   :  { %2230 = vmatpush3.bf16.msra.mxu1 %v2618_v21  ;;  %2070 = vmatprep.mubr.msk.f32.mxu1 %vm2498_vm3, %v2499_v23 }
 0x28e   :  { %2231 = vmatprep.subr.bf16.mxu1 %v2497_v20 }
 0x28f   :  { %v2649_v30 = vpop.permute.xlu1 %283 }
 0x291   :  { %2233 = vmatpush3.bf16.msra.mxu1 %v2629_v24 }
 0x292   :  { %2240 = vmatprep.subr.bf16.mxu1 %v2497_v20 }
 0x35f   :  { %v270_v31 = vpop.f32.mrb[0].mxu1 }
 0x360   :  { %v2050_v32 = vpop.f32.mrb[1].mxu1  ;;  %v286_v33 = vadd.f32 %v2649_v30, %v270_v31  ;;  %v276_v35 = vadd.f32 %v275_v34, %v270_v31 }
 0x362   :  { %288 = vrot.lane.b32.xlu0 %v286_v33, %s2496_s3  ;;  %v1917_v36 = vmul.f32 -1.442695, %v276_v35  ;;  %v599_v35 = vld [vmem:[#allocation2 + $0x8] sm:$0x3] }
 0x364   :  { %2330 = vpow2.f32 %v1917_v36 }
 0x36e   :  { %v2331_v37 = vpop.eup %2330 }
 0x36f   :  { %v280_v38 = vadd.f32 1.0, %v2331_v37 }
 0x371   :  { %2332 = vrcp.f32 %v280_v38 }
 0x37b   :  { %v2333_v39 = vpop.eup %2332 }
 0x37c   :  { %v298_v45 = vsub.f32 1.0, %v2333_v39  ;;  %v304_v47 = vmul.f32 %v2333_v39, %v194_v28 }
 0x3d4   :  { %v289_v40 = vpop.permute.xlu0 %288 }
 0x3d5   :  { %v291_v41 = vmul.f32 %v2333_v39, %v289_v40 }
 0x3d7   :  { %293 = vrot.lane.b32.xlu1 %v291_v41, %s2496_s3 }
 0x449   :  { %v294_v42 = vpop.permute.xlu1 %293 }
 0x44a   :  { %v296_v43 = vadd.f32 %v294_v42, %v275_v34 }
 0x44c   :  { %2334 = vtanh.f32 %v296_v43 }
 0x456   :  { %v2335_v44 = vpop.eup %2334 }
 0x457   :  { %300 = vrot.lane.b32.xlu0 %v2335_v44, %s2500_s2 }
 0x4c9   :  { %v301_v46 = vpop.permute.xlu0 %300 }
 0x4ca   :  { %v303_v48 = vmul.f32 %v301_v46, %v298_v45 }
 0x4cc   :  { %v305_v49 = vadd.f32 %v304_v47, %v303_v48 }
 0x4ce   :  { %307 = vrot.lane.b32.xlu1 %v305_v49, %s2500_s2 }
 0x540   :  { %v308_v50 = vpop.permute.xlu1 %307 }
 0x541   :  { %311 = vst.msk [vmem:[#allocation3 + $0x2] sm:$0x3] %vm199_vm4, %v308_v50  ;;  %2060 = vmatmul.mubr.msk.f32.vlgmr.msra.gmra.mrb[2].mxu0 %vm201_vm5, %v308_v50 }
 0x542   :  { %2236 = vmatpush3.bf16.msra.mxu0 %v2618_v21  ;;  %2081 = vmatprep.mubr.msk.f32.mxu0 %vm2498_vm3, %v2499_v23 }
 0x543   :  { %2237 = vmatprep.subr.bf16.mxu0 %v2497_v20 }
 0x546   :  { %2239 = vmatpush3.bf16.msra.mxu0 %v2629_v24 }
 0x547   :  { %2246 = vmatprep.subr.bf16.mxu0 %v2497_v20 }
 0x614   :  { %v380_v51 = vpop.f32.mrb[2].mxu0 }
 0x615   :  { %v393_v52 = vadd.f32 %v380_v51, %v2649_v30  ;;  %v2061_v53 = vpop.f32.mrb[3].mxu0  ;;  %v386_v55 = vadd.f32 %v385_v54, %v380_v51 }
 0x617   :  { %395 = vrot.lane.b32.xlu0 %v393_v52, %s2496_s3  ;;  %v1919_v56 = vmul.f32 -1.442695, %v386_v55  ;;  %v706_v55 = vld [vmem:[#allocation2 + $0xa] sm:$0x3] }
 0x619   :  { %2336 = vpow2.f32 %v1919_v56 }
 0x623   :  { %v2337_v57 = vpop.eup %2336 }
 0x624   :  { %v390_v58 = vadd.f32 1.0, %v2337_v57 }
 0x626   :  { %2338 = vrcp.f32 %v390_v58 }
 0x630   :  { %v2339_v59 = vpop.eup %2338 }
 0x631   :  { %v405_v1 = vsub.f32 1.0, %v2339_v59  ;;  %v411_v3 = vmul.f32 %v2339_v59, %v305_v49 }
 0x689   :  { %v396_v60 = vpop.permute.xlu0 %395 }
 0x68a   :  { %v398_v61 = vmul.f32 %v2339_v59, %v396_v60 }
 0x68c   :  { %400 = vrot.lane.b32.xlu1 %v398_v61, %s2496_s3 }
 0x6fe   :  { %v401_v62 = vpop.permute.xlu1 %400 }
 0x6ff   :  { %v403_v63 = vadd.f32 %v401_v62, %v385_v54 }
 0x701   :  { %2340 = vtanh.f32 %v403_v63 }
 0x70b   :  { %v2341_v0 = vpop.eup %2340 }
 0x70c   :  { %407 = vrot.lane.b32.xlu0 %v2341_v0, %s2500_s2 }
 0x77e   :  { %v408_v2 = vpop.permute.xlu0 %407 }
 0x77f   :  { %v410_v4 = vmul.f32 %v408_v2, %v405_v1 }
 0x781   :  { %v412_v5 = vadd.f32 %v411_v3, %v410_v4 }
 0x783   :  { %414 = vrot.lane.b32.xlu1 %v412_v5, %s2500_s2 }
 0x7f5   :  { %v415_v6 = vpop.permute.xlu1 %414 }
 0x7f6   :  { %418 = vst.msk [vmem:[#allocation3 + $0x4] sm:$0x3] %vm199_vm4, %v415_v6  ;;  %2071 = vmatmul.mubr.msk.f32.vlgmr.msra.gmra.mrb[2].mxu1 %vm201_vm5, %v415_v6 }
 0x7f7   :  { %2242 = vmatpush3.bf16.msra.mxu1 %v2618_v21  ;;  %2092 = vmatprep.mubr.msk.f32.mxu1 %vm2498_vm3, %v2499_v23 }
 0x7f8   :  { %2243 = vmatprep.subr.bf16.mxu1 %v2497_v20 }
 0x7fb   :  { %2245 = vmatpush3.bf16.msra.mxu1 %v2629_v24 }
 0x7fc   :  { %2252 = vmatprep.subr.bf16.mxu1 %v2497_v20 }
 0x8c9   :  { %v487_v7 = vpop.f32.mrb[2].mxu1 }
 0x8ca   :  { %v500_v8 = vadd.f32 %v487_v7, %v2649_v30  ;;  %v2072_v9 = vpop.f32.mrb[3].mxu1  ;;  %v493_v11 = vadd.f32 %v492_v10, %v487_v7 }
 0x8cc   :  { %502 = vrot.lane.b32.xlu0 %v500_v8, %s2496_s3  ;;  %v1921_v12 = vmul.f32 -1.442695, %v493_v11 }
 0x8ce   :  { %2342 = vpow2.f32 %v1921_v12 }
 0x8d8   :  { %v2343_v13 = vpop.eup %2342 }
 0x8d9   :  { %v497_v14 = vadd.f32 1.0, %v2343_v13 }
 0x8db   :  { %2344 = vrcp.f32 %v497_v14 }
 0x8e5   :  { %v2345_v15 = vpop.eup %2344 }
 0x8e6   :  { %v512_v25 = vsub.f32 1.0, %v2345_v15  ;;  %v518_v27 = vmul.f32 %v2345_v15, %v412_v5 }
 0x93e   :  { %v503_v16 = vpop.permute.xlu0 %502 }
 0x93f   :  { %v505_v17 = vmul.f32 %v2345_v15, %v503_v16 }
 0x941   :  { %507 = vrot.lane.b32.xlu1 %v505_v17, %s2496_s3 }
 0x9b3   :  { %v508_v18 = vpop.permute.xlu1 %507 }
 0x9b4   :  { %v510_v19 = vadd.f32 %v508_v18, %v492_v10  ;;  %v813_v10 = vld [vmem:[#allocation2 + $0xc] sm:$0x3] }
 0x9b6   :  { %2346 = vtanh.f32 %v510_v19 }
 0x9c0   :  { %v2347_v22 = vpop.eup %2346 }
 0x9c1   :  { %514 = vrot.lane.b32.xlu0 %v2347_v22, %s2500_s2 }
 0xa33   :  { %v515_v26 = vpop.permute.xlu0 %514 }
 0xa34   :  { %v517_v28 = vmul.f32 %v515_v26, %v512_v25 }
 0xa36   :  { %v519_v29 = vadd.f32 %v518_v27, %v517_v28 }
 0xa38   :  { %521 = vrot.lane.b32.xlu1 %v519_v29, %s2500_s2 }
 0xaaa   :  { %v522_v31 = vpop.permute.xlu1 %521 }
 0xaab   :  { %525 = vst.msk [vmem:[#allocation3 + $0x6] sm:$0x3] %vm199_vm4, %v522_v31  ;;  %2082 = vmatmul.mubr.msk.f32.vlgmr.msra.gmra.mrb[4].mxu0 %vm201_vm5, %v522_v31 }
 0xaac   :  { %2248 = vmatpush3.bf16.msra.mxu0 %v2618_v21  ;;  %2103 = vmatprep.mubr.msk.f32.mxu0 %vm2498_vm3, %v2499_v23 }
 0xaad   :  { %2249 = vmatprep.subr.bf16.mxu0 %v2497_v20 }
 0xab0   :  { %2251 = vmatpush3.bf16.msra.mxu0 %v2629_v24 }
 0xab2   :  { %v954_v6 = vld [vmem:[#allocation3] sm:$0xff] }
 0xb7e   :  { %v594_v32 = vpop.f32.mrb[4].mxu0 }
 0xb7f   :  { %v607_v33 = vadd.f32 %v594_v32, %v2649_v30  ;;  %v2083_v34 = vpop.f32.mrb[5].mxu0  ;;  %v600_v36 = vadd.f32 %v599_v35, %v594_v32 }
 0xb81   :  { %609 = vrot.lane.b32.xlu0 %v607_v33, %s2496_s3  ;;  %v1923_v37 = vmul.f32 -1.442695, %v600_v36 }
 0xb83   :  { %2348 = vpow2.f32 %v1923_v37 }
 0xb8d   :  { %v2349_v38 = vpop.eup %2348 }
 0xb8e   :  { %v604_v39 = vadd.f32 1.0, %v2349_v38 }
 0xb90   :  { %2350 = vrcp.f32 %v604_v39 }
 0xb9a   :  { %v2351_v40 = vpop.eup %2350 }
 0xb9b   :  { %v619_v46 = vsub.f32 1.0, %v2351_v40  ;;  %v625_v48 = vmul.f32 %v2351_v40, %v519_v29 }
 0xbf3   :  { %v610_v41 = vpop.permute.xlu0 %609 }
 0xbf4   :  { %v612_v42 = vmul.f32 %v2351_v40, %v610_v41 }
 0xbf6   :  { %614 = vrot.lane.b32.xlu1 %v612_v42, %s2496_s3 }
 0xc68   :  { %v615_v43 = vpop.permute.xlu1 %614 }
 0xc69   :  { %v617_v44 = vadd.f32 %v615_v43, %v599_v35  ;;  %v920_v35 = vld [vmem:[#allocation2 + $0xe] sm:$0x3] }
 0xc6b   :  { %2352 = vtanh.f32 %v617_v44 }
 0xc75   :  { %v2353_v45 = vpop.eup %2352 }
 0xc76   :  { %621 = vrot.lane.b32.xlu0 %v2353_v45, %s2500_s2 }
 0xce8   :  { %v622_v47 = vpop.permute.xlu0 %621 }
 0xce9   :  { %v624_v49 = vmul.f32 %v622_v47, %v619_v46  ;;  %v957_v46 = vld [vmem:[%s2874_s5 + $0x8] sm:$0xff] }
 0xceb   :  { %v626_v50 = vadd.f32 %v625_v48, %v624_v49  ;;  %v958_v48 = vld [vmem:[%s2874_s5 + $0x10] sm:$0xff]  ;;  %v959_v49 = vld [vmem:[%s2874_s5 + $0x18] sm:$0xff] }
 0xced   :  { %628 = vrot.lane.b32.xlu1 %v626_v50, %s2500_s2 }
 0xd5f   :  { %v629_v51 = vpop.permute.xlu1 %628 }
 0xd60   :  { %632 = vst.msk [vmem:[#allocation3 + $0x8] sm:$0x3] %vm199_vm4, %v629_v51  ;;  %2093 = vmatmul.mubr.msk.f32.vlgmr.msra.gmra.mrb[4].mxu1 %vm201_vm5, %v629_v51 }
 0xd61   :  { %2254 = vmatpush3.bf16.msra.mxu1 %v2618_v21  ;;  %2114 = vmatprep.mubr.msk.f32.mxu1 %vm2498_vm3, %v2499_v23 }
 0xd62   :  { %2255 = vmatprep.subr.bf16.mxu1 %v2497_v20 }
 0xd65   :  { %2257 = vmatpush3.bf16.msra.mxu1 %v2629_v24 }
 0xd66   :  { %2266 = vmatprep.subr.bf16.mxu1 %v2497_v20 }
 0xe33   :  { %v701_v52 = vpop.f32.mrb[4].mxu1 }
 0xe34   :  { %v714_v53 = vadd.f32 %v701_v52, %v2649_v30  ;;  %v2094_v54 = vpop.f32.mrb[5].mxu1  ;;  %v707_v56 = vadd.f32 %v706_v55, %v701_v52 }
 0xe36   :  { %716 = vrot.lane.b32.xlu0 %v714_v53, %s2496_s3  ;;  %v1925_v57 = vmul.f32 -1.442695, %v707_v56 }
 0xe38   :  { %2354 = vpow2.f32 %v1925_v57 }
 0xe42   :  { %v2355_v21 = vpop.eup %2354 }
 0xe43   :  { %v711_v58 = vadd.f32 1.0, %v2355_v21  ;;  %v1930_v21 = vld [vmem:[%s2876_s7] ss:$0 sm:$0xff] }
 0xe45   :  { %2356 = vrcp.f32 %v711_v58 }
 0xe4f   :  { %v2357_v59 = vpop.eup %2356 }
 0xe50   :  { %v726_v0 = vsub.f32 1.0, %v2357_v59  ;;  %v732_v2 = vmul.f32 %v2357_v59, %v626_v50  ;;  %v2262_v50 = vpack.c.bf16 %v959_v49, %v958_v48 }
 0xea8   :  { %v717_v60 = vpop.permute.xlu0 %716 }
 0xea9   :  { %v719_v61 = vmul.f32 %v2357_v59, %v717_v60 }
 0xeab   :  { %721 = vrot.lane.b32.xlu1 %v719_v61, %s2496_s3 }
 0xf1d   :  { %v722_v24 = vpop.permute.xlu1 %721 }
 0xf1e   :  { %v724_v62 = vadd.f32 %v722_v24, %v706_v55 }
 0xf20   :  { %2358 = vtanh.f32 %v724_v62 }
 0xf2a   :  { %v2359_v63 = vpop.eup %2358 }
 0xf2b   :  { %728 = vrot.lane.b32.xlu0 %v2359_v63, %s2500_s2 }
 0xf9d   :  { %v729_v1 = vpop.permute.xlu0 %728 }
 0xf9e   :  { %v731_v3 = vmul.f32 %v729_v1, %v726_v0  ;;  %v1933_v1 = vld [vmem:[%s2877_s8] ss:$0 sm:$0xff] }
 0xfa0   :  { %v733_v4 = vadd.f32 %v732_v2, %v731_v3 }
 0xfa2   :  { %735 = vrot.lane.b32.xlu1 %v733_v4, %s2500_s2 }
0x1014   :  { %v736_v5 = vpop.permute.xlu1 %735 }
0x1015   :  { %739 = vst.msk [vmem:[#allocation3 + $0xa] sm:$0x3] %vm199_vm4, %v736_v5  ;;  %2104 = vmatmul.mubr.msk.f32.vlgmr.msra.gmra.mrb[6].mxu0 %vm201_vm5, %v736_v5 }
0x1016   :  { %2125 = vmatprep.mubr.msk.f32.mxu0 %vm201_vm5, %v954_v6  ;;  %v1050_v6 = vld [vmem:[#allocation7] sm:$0xff] }
0x10e8   :  { %v808_v7 = vpop.f32.mrb[6].mxu0 }
0x10e9   :  { %v821_v8 = vadd.f32 %v808_v7, %v2649_v30  ;;  %v2105_v9 = vpop.f32.mrb[7].mxu0  ;;  %v814_v11 = vadd.f32 %v813_v10, %v808_v7  ;;  %v1051_v7 = vld [vmem:[#allocation7 + $0x8] sm:$0xff] }
0x10ea   :  { %v2750_v9 = vpack.c.bf16 %v1051_v7, %v1050_v6 }
0x10eb   :  { %823 = vrot.lane.b32.xlu0 %v821_v8, %s2496_s3  ;;  %v1927_v12 = vmul.f32 -1.442695, %v814_v11  ;;  %v1052_v8 = vld [vmem:[#allocation7 + $0x10] sm:$0xff] }
0x10ed   :  { %2360 = vpow2.f32 %v1927_v12 }
0x10f7   :  { %v2361_v13 = vpop.eup %2360 }
0x10f8   :  { %v818_v14 = vadd.f32 1.0, %v2361_v13 }
0x10fa   :  { %2362 = vrcp.f32 %v818_v14 }
0x1104   :  { %v2363_v15 = vpop.eup %2362 }
0x1105   :  { %v833_v25 = vsub.f32 1.0, %v2363_v15  ;;  %v839_v27 = vmul.f32 %v2363_v15, %v733_v4 }
0x115d   :  { %v824_v16 = vpop.permute.xlu0 %823 }
0x115e   :  { %v826_v17 = vmul.f32 %v2363_v15, %v824_v16 }
0x1160   :  { %828 = vrot.lane.b32.xlu1 %v826_v17, %s2496_s3 }
0x11d2   :  { %v829_v18 = vpop.permute.xlu1 %828 }
0x11d3   :  { %v831_v19 = vadd.f32 %v829_v18, %v813_v10  ;;  %v1053_v10 = vld [vmem:[#allocation7 + $0x18] sm:$0xff] }
0x11d4   :  { %v2753_v11 = vpack.c.bf16 %v1053_v10, %v1052_v8 }
0x11d5   :  { %2364 = vtanh.f32 %v831_v19 }
0x11df   :  { %v2365_v22 = vpop.eup %2364 }
0x11e0   :  { %835 = vrot.lane.b32.xlu0 %v2365_v22, %s2500_s2 }
0x1252   :  { %v836_v26 = vpop.permute.xlu0 %835 }
0x1253   :  { %v838_v28 = vmul.f32 %v836_v26, %v833_v25 }
0x1255   :  { %v840_v29 = vadd.f32 %v839_v27, %v838_v28 }
0x1257   :  { %842 = vrot.lane.b32.xlu1 %v840_v29, %s2500_s2 }
0x12c9   :  { %v843_v31 = vpop.permute.xlu1 %842 }
0x12ca   :  { %846 = vst.msk [vmem:[#allocation3 + $0xc] sm:$0x3] %vm199_vm4, %v843_v31  ;;  %2115 = vmatmul.mubr.msk.f32.vlgmr.msra.gmra.mrb[6].mxu1 %vm201_vm5, %v843_v31 }
0x12cb   :  { %2136 = vmatprep.mubr.msk.f32.mxu1 %vm2498_vm3, %v2499_v23  ;;  %2268 = vmatpush3.bf16.msra.mxu1 %v2750_v9 }
0x12cc   :  { %2269 = vmatprep.subr.bf16.mxu1 %v2497_v20 }
0x12cf   :  { %2271 = vmatpush3.bf16.msra.mxu1 %v2753_v11 }
0x12d0   :  { %2278 = vmatprep.subr.bf16.mxu1 %v2497_v20 }
0x139d   :  { %v915_v32 = vpop.f32.mrb[6].mxu1 }
0x139e   :  { %v928_v33 = vadd.f32 %v915_v32, %v2649_v30  ;;  %v2116_v34 = vpop.f32.mrb[7].mxu1  ;;  %v921_v36 = vadd.f32 %v920_v35, %v915_v32  ;;  %v956_v30 = vld [vmem:[%s2874_s5] sm:$0xff] }
0x139f   :  { %v2258_v47 = vpack.c.bf16 %v957_v46, %v956_v30 }
0x13a0   :  { %930 = vrot.lane.b32.xlu0 %v928_v33, %s2496_s3  ;;  %v1929_v37 = vmul.f32 -1.442695, %v921_v36 }
0x13a1   :  { %2259 = vmatprep.subr.bf16.mxu0 %v2258_v47 }
0x13a2   :  { %2366 = vpow2.f32 %v1929_v37  ;;  %2261 = vmatpush3.bf16.msra.mxu0 %v2258_v47 }
0x13a3   :  { %2263 = vmatprep.subr.bf16.mxu0 %v2262_v50 }
0x13a6   :  { %2265 = vmatpush3.bf16.msra.mxu0 %v2262_v50 }
0x13a7   :  { %2272 = vmatprep.subr.bf16.mxu0 %v2497_v20 }
0x13ac   :  { %v2367_v38 = vpop.eup %2366 }
0x13ad   :  { %v925_v39 = vadd.f32 1.0, %v2367_v38 }
0x13af   :  { %2368 = vrcp.f32 %v925_v39 }
0x13b9   :  { %v2369_v40 = vpop.eup %2368 }
0x13ba   :  { %v940_v51 = vsub.f32 1.0, %v2369_v40  ;;  %v946_v53 = vmul.f32 %v2369_v40, %v840_v29 }
0x1412   :  { %v931_v41 = vpop.permute.xlu0 %930 }
0x1413   :  { %v933_v42 = vmul.f32 %v2369_v40, %v931_v41 }
0x1415   :  { %935 = vrot.lane.b32.xlu1 %v933_v42, %s2496_s3 }
0x1487   :  { %v936_v43 = vpop.permute.xlu1 %935 }
0x1488   :  { %v938_v44 = vadd.f32 %v936_v43, %v920_v35 }
0x148a   :  { %2370 = vtanh.f32 %v938_v44 }
0x1494   :  { %v2371_v45 = vpop.eup %2370 }
0x1495   :  { %942 = vrot.lane.b32.xlu0 %v2371_v45, %s2500_s2 }
0x1507   :  { %v943_v52 = vpop.permute.xlu0 %942 }
0x1508   :  { %v945_v54 = vmul.f32 %v943_v52, %v940_v51 }
0x150a   :  { %v947_v55 = vadd.f32 %v946_v53, %v945_v54 }
0x150c   :  { %949 = vrot.lane.b32.xlu1 %v947_v55, %s2500_s2 }
0x157e   :  { %v950_v56 = vpop.permute.xlu1 %949 }
0x157f   :  { %953 = vst.msk [vmem:[#allocation3 + $0xe] sm:$0x3] %vm199_vm4, %v950_v56 }
0x1586   :  { %v955_v57 = vld [vmem:[#allocation3 + $0x8] sm:$0xff] }
0x1587   :  { %2126 = vmatmul.mubr.msk.f32.vlgmr.msra.gmra.mrb[8].mxu0 %vm201_vm5, %v955_v57 }
0x1588   :  { %2147 = vmatprep.mubr.msk.f32.mxu0 %vm2498_vm3, %v2499_v23  ;;  %2274 = vmatpush3.bf16.msra.mxu0 %v2750_v9 }
0x1589   :  { %2275 = vmatprep.subr.bf16.mxu0 %v2497_v20 }
0x158c   :  { %2277 = vmatpush3.bf16.msra.mxu0 %v2753_v11 }
0x158d   :  { %2284 = vmatprep.subr.bf16.mxu0 %v2497_v20 }
0x165a   :  { %v2127_v58 = vpop.f32.mrb[8].mxu0 }
0x165b   :  { %v1045_v59 = vadd.f32 %v2127_v58, %v1930_v21  ;;  %v1039_v60 = vpop.f32.mrb[9].mxu0 }
0x165c   :  { %v1040_v61 = vadd.f32 %v1930_v21, %v1039_v60 }
0x165d   :  { %1049 = vst.msk [vmem:[#allocation2 + $0x8] sm:$0xff] %vm161_vm2, %v1045_v59 }
0x165e   :  { %1048 = vst.msk [vmem:[#allocation2] sm:$0xff] %vm161_vm2, %v1040_v61 }
0x1665   :  { %v1061_v24 = vld [vmem:[#allocation2] sm:$0x3]  ;;  %v1156_v25 = vld [vmem:[#allocation2 + $0x2] sm:$0x3]  ;;  %v1262_v30 = vld [vmem:[#allocation2 + $0x4] sm:$0x3] }
0x1666   :  { %v1934_v62 = vmul.f32 -1.442695, %v1061_v24 }
0x1668   :  { %2372 = vpow2.f32 %v1934_v62 }
0x1672   :  { %v2373_v63 = vpop.eup %2372 }
0x1673   :  { %v1065_v0 = vadd.f32 1.0, %v2373_v63  ;;  %v1365_v63 = vld [vmem:[#allocation2 + $0x6] sm:$0x3] }
0x1675   :  { %2374 = vrcp.f32 %v1065_v0 }
0x167f   :  { %v2375_v2 = vpop.eup %2374 }
0x1680   :  { %v1068_v3 = vmul.f32 %v2375_v2, %v1933_v1  ;;  %v1075_v13 = vsub.f32 1.0, %v2375_v2 }
0x1682   :  { %1070 = vrot.lane.b32.xlu0 %v1068_v3, %s2496_s3 }
0x16f4   :  { %v1071_v4 = vpop.permute.xlu0 %1070 }
0x16f5   :  { %v1073_v5 = vadd.f32 %v1071_v4, %v1061_v24 }
0x16f7   :  { %2376 = vtanh.f32 %v1073_v5 }
0x1701   :  { %v2377_v12 = vpop.eup %2376 }
0x1702   :  { %1077 = vrot.lane.b32.xlu1 %v2377_v12, %s2500_s2 }
0x1706   :  { %1164 = vrot.lane.b32.xlu1 %v1933_v1, %s2496_s3 }
0x1774   :  { %v1078_v14 = vpop.permute.xlu1 %1077 }
0x1775   :  { %v1080_v15 = vmul.f32 %v1078_v14, %v1075_v13 }
0x1777   :  { %1082 = vrot.lane.b32.xlu0 %v1080_v15, %s2500_s2 }
0x1778   :  { %v2772_v17 = vpop.permute.xlu1 %1164 }
0x17e9   :  { %v1083_v16 = vpop.permute.xlu0 %1082 }
0x17ea   :  { %2137 = vmatmul.mubr.msk.f32.vlgmr.msra.gmra.mrb[8].mxu1 %vm201_vm5, %v1083_v16 }
0x17eb   :  { %2280 = vmatpush3.bf16.msra.mxu1 %v2750_v9  ;;  %2158 = vmatprep.mubr.msk.f32.mxu1 %vm2498_vm3, %v2499_v23 }
0x17ec   :  { %2281 = vmatprep.subr.bf16.mxu1 %v2497_v20 }
0x17ef   :  { %2283 = vmatpush3.bf16.msra.mxu1 %v2753_v11 }
0x17f0   :  { %2290 = vmatprep.subr.bf16.mxu1 %v2497_v20 }
0x18bd   :  { %v1152_v18 = vpop.f32.mrb[8].mxu1 }
0x18be   :  { %v2138_v19 = vpop.f32.mrb[9].mxu1  ;;  %v1167_v22 = vadd.f32 %v2772_v17, %v1152_v18  ;;  %v1157_v26 = vadd.f32 %v1156_v25, %v1152_v18 }
0x18c0   :  { %1169 = vrot.lane.b32.xlu0 %v1167_v22, %s2496_s3  ;;  %v1936_v27 = vmul.f32 -1.442695, %v1157_v26  ;;  %v1468_v26 = vld [vmem:[#allocation2 + $0x8] sm:$0x3] }
0x18c2   :  { %2378 = vpow2.f32 %v1936_v27 }
0x18cc   :  { %v2379_v28 = vpop.eup %2378 }
0x18cd   :  { %v1161_v29 = vadd.f32 1.0, %v2379_v28 }
0x18cf   :  { %2380 = vrcp.f32 %v1161_v29 }
0x18d9   :  { %v2381_v31 = vpop.eup %2380 }
0x18da   :  { %v1179_v37 = vsub.f32 1.0, %v2381_v31  ;;  %v1185_v39 = vmul.f32 %v2381_v31, %v1080_v15 }
0x1932   :  { %v1170_v32 = vpop.permute.xlu0 %1169 }
0x1933   :  { %v1172_v33 = vmul.f32 %v2381_v31, %v1170_v32 }
0x1935   :  { %1174 = vrot.lane.b32.xlu1 %v1172_v33, %s2496_s3 }
0x19a7   :  { %v1175_v34 = vpop.permute.xlu1 %1174 }
0x19a8   :  { %v1177_v35 = vadd.f32 %v1175_v34, %v1156_v25 }
0x19aa   :  { %2382 = vtanh.f32 %v1177_v35 }
0x19b4   :  { %v2383_v36 = vpop.eup %2382 }
0x19b5   :  { %1181 = vrot.lane.b32.xlu0 %v2383_v36, %s2500_s2 }
0x1a27   :  { %v1182_v38 = vpop.permute.xlu0 %1181 }
0x1a28   :  { %v1184_v40 = vmul.f32 %v1182_v38, %v1179_v37 }
0x1a2a   :  { %v1186_v41 = vadd.f32 %v1185_v39, %v1184_v40 }
0x1a2c   :  { %1188 = vrot.lane.b32.xlu1 %v1186_v41, %s2500_s2 }
0x1a9e   :  { %v1189_v42 = vpop.permute.xlu1 %1188 }
0x1a9f   :  { %2148 = vmatmul.mubr.msk.f32.vlgmr.msra.gmra.mrb[10].mxu0 %vm201_vm5, %v1189_v42 }
0x1aa0   :  { %2286 = vmatpush3.bf16.msra.mxu0 %v2750_v9  ;;  %2169 = vmatprep.mubr.msk.f32.mxu0 %vm2498_vm3, %v2499_v23 }
0x1aa1   :  { %2287 = vmatprep.subr.bf16.mxu0 %v2497_v20 }
0x1aa4   :  { %2289 = vmatpush3.bf16.msra.mxu0 %v2753_v11 }
0x1aa5   :  { %2296 = vmatprep.subr.bf16.mxu0 %v2497_v20 }
0x1b72   :  { %v1258_v43 = vpop.f32.mrb[10].mxu0 }
0x1b73   :  { %v1270_v44 = vadd.f32 %v1258_v43, %v2772_v17  ;;  %v2149_v45 = vpop.f32.mrb[11].mxu0  ;;  %v1263_v46 = vadd.f32 %v1262_v30, %v1258_v43 }
0x1b75   :  { %1272 = vrot.lane.b32.xlu0 %v1270_v44, %s2496_s3  ;;  %v1938_v47 = vmul.f32 -1.442695, %v1263_v46  ;;  %v1571_v46 = vld [vmem:[#allocation2 + $0xa] sm:$0x3] }
0x1b77   :  { %2384 = vpow2.f32 %v1938_v47 }
0x1b81   :  { %v2385_v48 = vpop.eup %2384 }
0x1b82   :  { %v1267_v49 = vadd.f32 1.0, %v2385_v48 }
0x1b84   :  { %2386 = vrcp.f32 %v1267_v49 }
0x1b8e   :  { %v2387_v50 = vpop.eup %2386 }
0x1b8f   :  { %v1282_v56 = vsub.f32 1.0, %v2387_v50  ;;  %v1288_v21 = vmul.f32 %v2387_v50, %v1186_v41 }
0x1be7   :  { %v1273_v51 = vpop.permute.xlu0 %1272 }
0x1be8   :  { %v1275_v52 = vmul.f32 %v2387_v50, %v1273_v51 }
0x1bea   :  { %1277 = vrot.lane.b32.xlu1 %v1275_v52, %s2496_s3 }
0x1c5c   :  { %v1278_v53 = vpop.permute.xlu1 %1277 }
0x1c5d   :  { %v1280_v54 = vadd.f32 %v1278_v53, %v1262_v30 }
0x1c5f   :  { %2388 = vtanh.f32 %v1280_v54 }
0x1c69   :  { %v2389_v55 = vpop.eup %2388 }
0x1c6a   :  { %1284 = vrot.lane.b32.xlu0 %v2389_v55, %s2500_s2 }
0x1cdc   :  { %v1285_v57 = vpop.permute.xlu0 %1284 }
0x1cdd   :  { %v1287_v58 = vmul.f32 %v1285_v57, %v1282_v56 }
0x1cdf   :  { %v1289_v59 = vadd.f32 %v1288_v21, %v1287_v58 }
0x1ce1   :  { %1291 = vrot.lane.b32.xlu1 %v1289_v59, %s2500_s2 }
0x1d53   :  { %v1292_v60 = vpop.permute.xlu1 %1291 }
0x1d54   :  { %2159 = vmatmul.mubr.msk.f32.vlgmr.msra.gmra.mrb[10].mxu1 %vm201_vm5, %v1292_v60 }
0x1d55   :  { %2292 = vmatpush3.bf16.msra.mxu1 %v2750_v9  ;;  %2180 = vmatprep.mubr.msk.f32.mxu1 %vm2498_vm3, %v2499_v23 }
0x1d56   :  { %2293 = vmatprep.subr.bf16.mxu1 %v2497_v20 }
0x1d59   :  { %2295 = vmatpush3.bf16.msra.mxu1 %v2753_v11 }
0x1d5a   :  { %2302 = vmatprep.subr.bf16.mxu1 %v2497_v20 }
0x1e27   :  { %v1361_v61 = vpop.f32.mrb[10].mxu1 }
0x1e28   :  { %v1373_v24 = vadd.f32 %v1361_v61, %v2772_v17  ;;  %v2160_v62 = vpop.f32.mrb[11].mxu1  ;;  %v1366_v0 = vadd.f32 %v1365_v63, %v1361_v61 }
0x1e29   :  { %v1674_v62 = vld [vmem:[#allocation2 + $0xc] sm:$0x3] }
0x1e2a   :  { %1375 = vrot.lane.b32.xlu0 %v1373_v24, %s2496_s3  ;;  %v1940_v1 = vmul.f32 -1.442695, %v1366_v0 }
0x1e2c   :  { %2390 = vpow2.f32 %v1940_v1 }
0x1e36   :  { %v2391_v2 = vpop.eup %2390 }
0x1e37   :  { %v1370_v3 = vadd.f32 1.0, %v2391_v2 }
0x1e39   :  { %2392 = vrcp.f32 %v1370_v3 }
0x1e43   :  { %v2393_v4 = vpop.eup %2392 }
0x1e44   :  { %v1385_v12 = vsub.f32 1.0, %v2393_v4  ;;  %v1391_v14 = vmul.f32 %v2393_v4, %v1289_v59 }
0x1e9c   :  { %v1376_v5 = vpop.permute.xlu0 %1375 }
0x1e9d   :  { %v1378_v6 = vmul.f32 %v2393_v4, %v1376_v5 }
0x1e9f   :  { %1380 = vrot.lane.b32.xlu1 %v1378_v6, %s2496_s3 }
0x1f11   :  { %v1381_v7 = vpop.permute.xlu1 %1380 }
0x1f12   :  { %v1383_v8 = vadd.f32 %v1381_v7, %v1365_v63 }
0x1f14   :  { %2394 = vtanh.f32 %v1383_v8 }
0x1f1e   :  { %v2395_v10 = vpop.eup %2394 }
0x1f1f   :  { %1387 = vrot.lane.b32.xlu0 %v2395_v10, %s2500_s2 }
0x1f91   :  { %v1388_v13 = vpop.permute.xlu0 %1387 }
0x1f92   :  { %v1390_v15 = vmul.f32 %v1388_v13, %v1385_v12 }
0x1f94   :  { %v1392_v16 = vadd.f32 %v1391_v14, %v1390_v15 }
0x1f96   :  { %1394 = vrot.lane.b32.xlu1 %v1392_v16, %s2500_s2 }
0x2008   :  { %v1395_v18 = vpop.permute.xlu1 %1394 }
0x2009   :  { %2170 = vmatmul.mubr.msk.f32.vlgmr.msra.gmra.mrb[12].mxu0 %vm201_vm5, %v1395_v18 }
0x200a   :  { %2298 = vmatpush3.bf16.msra.mxu0 %v2750_v9  ;;  %2191 = vmatprep.mubr.msk.f32.mxu0 %vm2498_vm3, %v2499_v23 }
0x200b   :  { %2299 = vmatprep.subr.bf16.mxu0 %v2497_v20 }
0x200e   :  { %2301 = vmatpush3.bf16.msra.mxu0 %v2753_v11 }
0x200f   :  { %2308 = vmatprep.subr.bf16.mxu0 %v2497_v20 }
0x20dc   :  { %v1464_v19 = vpop.f32.mrb[12].mxu0 }
0x20dd   :  { %v1476_v22 = vadd.f32 %v1464_v19, %v2772_v17  ;;  %v2171_v25 = vpop.f32.mrb[13].mxu0  ;;  %v1469_v27 = vadd.f32 %v1468_v26, %v1464_v19 }
0x20df   :  { %1478 = vrot.lane.b32.xlu0 %v1476_v22, %s2496_s3  ;;  %v1942_v28 = vmul.f32 -1.442695, %v1469_v27  ;;  %v1777_v22 = vld [vmem:[#allocation2 + $0xe] sm:$0x3] }
0x20e1   :  { %2396 = vpow2.f32 %v1942_v28 }
0x20eb   :  { %v2397_v29 = vpop.eup %2396 }
0x20ec   :  { %v1473_v31 = vadd.f32 1.0, %v2397_v29 }
0x20ee   :  { %2398 = vrcp.f32 %v1473_v31 }
0x20f8   :  { %v2399_v32 = vpop.eup %2398 }
0x20f9   :  { %v1488_v38 = vsub.f32 1.0, %v2399_v32  ;;  %v1494_v40 = vmul.f32 %v2399_v32, %v1392_v16 }
0x2151   :  { %v1479_v33 = vpop.permute.xlu0 %1478 }
0x2152   :  { %v1481_v34 = vmul.f32 %v2399_v32, %v1479_v33 }
0x2154   :  { %1483 = vrot.lane.b32.xlu1 %v1481_v34, %s2496_s3 }
0x21c6   :  { %v1484_v35 = vpop.permute.xlu1 %1483 }
0x21c7   :  { %v1486_v36 = vadd.f32 %v1484_v35, %v1468_v26  ;;  %v1807_v35 = vld [vmem:[%s2878_s9 + $0x8] sm:$0xff] }
0x21c9   :  { %2400 = vtanh.f32 %v1486_v36  ;;  %v1808_v36 = vld [vmem:[%s2878_s9 + $0x10] sm:$0xff] }
0x21d3   :  { %v2401_v37 = vpop.eup %2400 }
0x21d4   :  { %1490 = vrot.lane.b32.xlu0 %v2401_v37, %s2500_s2 }
0x2246   :  { %v1491_v39 = vpop.permute.xlu0 %1490 }
0x2247   :  { %v1493_v41 = vmul.f32 %v1491_v39, %v1488_v38  ;;  %v1809_v38 = vld [vmem:[%s2878_s9 + $0x18] sm:$0xff] }
0x2248   :  { %v2312_v39 = vpack.c.bf16 %v1809_v38, %v1808_v36 }
0x2249   :  { %v1495_v42 = vadd.f32 %v1494_v40, %v1493_v41 }
0x224b   :  { %1497 = vrot.lane.b32.xlu1 %v1495_v42, %s2500_s2 }
0x22bd   :  { %v1498_v43 = vpop.permute.xlu1 %1497 }
0x22be   :  { %2181 = vmatmul.mubr.msk.f32.vlgmr.msra.gmra.mrb[12].mxu1 %vm201_vm5, %v1498_v43 }
0x22bf   :  { %2304 = vmatpush3.bf16.msra.mxu1 %v2750_v9  ;;  %2202 = vmatprep.mubr.msk.f32.mxu1 %vm2498_vm3, %v2499_v23 }
0x22c0   :  { %2305 = vmatprep.subr.bf16.mxu1 %v2497_v20 }
0x22c3   :  { %2307 = vmatpush3.bf16.msra.mxu1 %v2753_v11 }
0x2391   :  { %v1567_v44 = vpop.f32.mrb[12].mxu1 }
0x2392   :  { %v1579_v45 = vadd.f32 %v1567_v44, %v2772_v17  ;;  %v2182_v30 = vpop.f32.mrb[13].mxu1  ;;  %v1572_v47 = vadd.f32 %v1571_v46, %v1567_v44 }
0x2394   :  { %1581 = vrot.lane.b32.xlu0 %v1579_v45, %s2496_s3  ;;  %v1944_v48 = vmul.f32 -1.442695, %v1572_v47  ;;  %v1949_v47 = vld [vmem:[%s2879_s10] ss:$0 sm:$0xff] }
0x2396   :  { %2402 = vpow2.f32 %v1944_v48 }
0x23a0   :  { %v2403_v49 = vpop.eup %2402 }
0x23a1   :  { %v1576_v50 = vadd.f32 1.0, %v2403_v49 }
0x23a3   :  { %2404 = vrcp.f32 %v1576_v50 }
0x23ad   :  { %v2405_v9 = vpop.eup %2404 }
0x23ae   :  { %v1591_v55 = vsub.f32 1.0, %v2405_v9  ;;  %v1597_v57 = vmul.f32 %v2405_v9, %v1495_v42 }
0x2406   :  { %v1582_v51 = vpop.permute.xlu0 %1581 }
0x2407   :  { %v1584_v52 = vmul.f32 %v2405_v9, %v1582_v51 }
0x2409   :  { %1586 = vrot.lane.b32.xlu1 %v1584_v52, %s2496_s3 }
0x247b   :  { %v1587_v53 = vpop.permute.xlu1 %1586 }
0x247c   :  { %v1589_v11 = vadd.f32 %v1587_v53, %v1571_v46 }
0x247e   :  { %2406 = vtanh.f32 %v1589_v11 }
0x2488   :  { %v2407_v54 = vpop.eup %2406 }
0x2489   :  { %1593 = vrot.lane.b32.xlu0 %v2407_v54, %s2500_s2 }
0x24fb   :  { %v1594_v56 = vpop.permute.xlu0 %1593 }
0x24fc   :  { %v1596_v21 = vmul.f32 %v1594_v56, %v1591_v55 }
0x24fe   :  { %v1598_v58 = vadd.f32 %v1597_v57, %v1596_v21 }
0x2500   :  { %1600 = vrot.lane.b32.xlu1 %v1598_v58, %s2500_s2 }
0x2572   :  { %v1601_v59 = vpop.permute.xlu1 %1600 }
0x2573   :  { %2192 = vmatmul.mubr.msk.f32.vlgmr.msra.gmra.mrb[14].mxu0 %vm201_vm5, %v1601_v59 }
0x2574   :  { %2213 = vmatprep.mubr.msk.f32.mxu0 %vm2498_vm3, %v2499_v23 }
0x2646   :  { %v1670_v60 = vpop.f32.mrb[14].mxu0 }
0x2647   :  { %v1682_v61 = vadd.f32 %v1670_v60, %v2772_v17  ;;  %v2193_v24 = vpop.f32.mrb[15].mxu0  ;;  %v1675_v63 = vadd.f32 %v1674_v62, %v1670_v60 }
0x2649   :  { %1684 = vrot.lane.b32.xlu0 %v1682_v61, %s2496_s3  ;;  %v1946_v0 = vmul.f32 -1.442695, %v1675_v63 }
0x264b   :  { %2408 = vpow2.f32 %v1946_v0 }
0x2655   :  { %v2409_v1 = vpop.eup %2408 }
0x2656   :  { %v1679_v2 = vadd.f32 1.0, %v2409_v1 }
0x2658   :  { %2410 = vrcp.f32 %v1679_v2 }
0x2662   :  { %v2411_v3 = vpop.eup %2410 }
0x2663   :  { %v1694_v8 = vsub.f32 1.0, %v2411_v3  ;;  %v1700_v12 = vmul.f32 %v2411_v3, %v1598_v58 }
0x26bb   :  { %v1685_v4 = vpop.permute.xlu0 %1684 }
0x26bc   :  { %v1687_v5 = vmul.f32 %v2411_v3, %v1685_v4 }
0x26be   :  { %1689 = vrot.lane.b32.xlu1 %v1687_v5, %s2496_s3 }
0x2730   :  { %v1690_v6 = vpop.permute.xlu1 %1689 }
0x2731   :  { %v1692_v23 = vadd.f32 %v1690_v6, %v1674_v62 }
0x2733   :  { %2412 = vtanh.f32 %v1692_v23 }
0x273d   :  { %v2413_v7 = vpop.eup %2412 }
0x273e   :  { %1696 = vrot.lane.b32.xlu0 %v2413_v7, %s2500_s2 }
0x27b0   :  { %v1697_v10 = vpop.permute.xlu0 %1696 }
0x27b1   :  { %v1699_v13 = vmul.f32 %v1697_v10, %v1694_v8 }
0x27b3   :  { %v1701_v14 = vadd.f32 %v1700_v12, %v1699_v13 }
0x27b5   :  { %1703 = vrot.lane.b32.xlu1 %v1701_v14, %s2500_s2 }
0x2827   :  { %v1704_v15 = vpop.permute.xlu1 %1703 }
0x2828   :  { %2203 = vmatmul.mubr.msk.f32.vlgmr.msra.gmra.mrb[14].mxu1 %vm201_vm5, %v1704_v15 }
0x28fb   :  { %v1773_v16 = vpop.f32.mrb[14].mxu1 }
0x28fc   :  { %v1785_v18 = vadd.f32 %v1773_v16, %v2772_v17  ;;  %v2204_v19 = vpop.f32.mrb[15].mxu1  ;;  %v1778_v25 = vadd.f32 %v1777_v22, %v1773_v16  ;;  %v1806_v17 = vld [vmem:[%s2878_s9] sm:$0xff] }
0x28fd   :  { %v2309_v37 = vpack.c.bf16 %v1807_v35, %v1806_v17 }
0x28fe   :  { %1787 = vrot.lane.b32.xlu0 %v1785_v18, %s2496_s3  ;;  %v1948_v26 = vmul.f32 -1.442695, %v1778_v25 }
0x28ff   :  { %2310 = vmatpush3.bf16.msra.mxu0 %v2309_v37 }
0x2900   :  { %2414 = vpow2.f32 %v1948_v26  ;;  %2311 = vmatprep.subr.bf16.mxu0 %v2497_v20 }
0x2903   :  { %2313 = vmatpush3.bf16.msra.mxu0 %v2312_v39 }
0x290a   :  { %v2415_v27 = vpop.eup %2414 }
0x290b   :  { %v1782_v28 = vadd.f32 1.0, %v2415_v27 }
0x290d   :  { %2416 = vrcp.f32 %v1782_v28 }
0x2917   :  { %v2417_v29 = vpop.eup %2416 }
0x2918   :  { %v1797_v41 = vsub.f32 1.0, %v2417_v29  ;;  %v1803_v43 = vmul.f32 %v2417_v29, %v1701_v14 }
0x2970   :  { %v1788_v31 = vpop.permute.xlu0 %1787 }
0x2971   :  { %v1790_v32 = vmul.f32 %v2417_v29, %v1788_v31 }
0x2973   :  { %1792 = vrot.lane.b32.xlu1 %v1790_v32, %s2496_s3 }
0x29e5   :  { %v1793_v33 = vpop.permute.xlu1 %1792 }
0x29e6   :  { %v1795_v34 = vadd.f32 %v1793_v33, %v1777_v22 }
0x29e8   :  { %2418 = vtanh.f32 %v1795_v34 }
0x29f2   :  { %v2419_v40 = vpop.eup %2418 }
0x29f3   :  { %1799 = vrot.lane.b32.xlu0 %v2419_v40, %s2500_s2 }
0x2a65   :  { %v1800_v42 = vpop.permute.xlu0 %1799 }
0x2a66   :  { %v1802_v44 = vmul.f32 %v1800_v42, %v1797_v41 }
0x2a68   :  { %v1804_v45 = vadd.f32 %v1803_v43, %v1802_v44 }
0x2a6a   :  { %v1805_v30 = vmax.f32 %v1804_v45, 0.0 }
0x2a6c   :  { %1818 = vrot.lane.b32.xlu1 %v1805_v30, %s2500_s2 }
0x2ade   :  { %v1819_v46 = vpop.permute.xlu1 %1818 }
0x2adf   :  { %2214 = vmatmul.mubr.msk.f32.vlgmr.msra.gmra.mrb[16].mxu0 %vm201_vm5, %v1819_v46 }
0x2bb2   :  { %v1888_v20 = vpop.f32.mrb[16].mxu0 }
0x2bb3   :  { %v1889_v48 = vadd.f32 %v1949_v47, %v1888_v20  ;;  %v2215_v49 = vpop.f32.mrb[17].mxu0 }
0x2bb5   :  { %1893 = vst.msk [vmem:[#allocation9] sm:$0x3] %vm1892_vm6, %v1889_v48 }
0x2bb6   :  { %2475 = shalt.err (!%p2472_p6)
}
0x2bb7   :  { %s2476_s16 = scalar_lea.hbm %s2880_s11, 32 }
0x2bb8   :  { %p2477_p7 = scmp.ne.s32.totalorder %s2880_s11, %s2476_s16  ;;  %p2480_p8 = scmp.lt.u32.totalorder %s2476_s16, %s2880_s11 }
0x2bba   :  { %p2482_p9 = pnand %p2480_p8, %p2477_p7 }
0x2bbc   :  { %2485 = shalt.err (!%p2482_p9)
}
0x2bbd   :  { %1903 = dma.vmem_to_hbm [thread:$0]  %s1901_s13, 32, %s2880_s11, [#allocation6]  }
0x2bbe   :  { %2490 = dma.done.wait [#allocation6], 32  }
0x2bbf   :  { %2491 = vsyncadd [#allocation6], 4294967264 }
0x2bc0   :  { %1907 = vsyncpa [#allocation5], 1 }
0x2bc1   :  { %1908 = vsyncpa [#allocation8], 1 }
0x2bc2   :  { %1909 = vsyncpa [#allocation6], 1 }

</bundles_post_ra>
